<compile_context>
chip_gen: v7x
topology: tpu7x:2x2x1
jax: 0.10.0
libtpu: 0.0.40
codegen_flags: <defaults>
</compile_context>

<pallas_src>
import functools

import jax
import jax.numpy as jnp
import numpy as np
from jax.experimental import pallas as pl
from jax.experimental.pallas import tpu as pltpu

EPS = 1e-5
LANE = 128


def _round_up(x, m):
    return ((x + m - 1) // m) * m


def _lds(start, size, stride):
    if stride == 1:
        return pl.ds(start, size)
    # TODO(synk): stride > 1 uses a strided pl.ds window load; not exercised by
    # the __main__ test below (stride=1 configurations only).
    return pl.ds(start, size, stride=stride)


def _vmem_budget():
    """Generation-aware VMEM limit + per-step tile working-set budget."""
    cap = 64 * 1024 * 1024                      # conservative default (v7x per-TC)
    try:
        info = pltpu.get_tpu_info()
        for attr in ("vmem_capacity_bytes", "vmem_size_bytes", "vmem_bytes"):
            v = getattr(info, attr, None)
            if v:
                cap = int(v)
                break
    except Exception:
        pass
    limit = int(cap * 5 // 8)                   # 40 MiB on v7x, 80 MiB on v5e/v6e
    tile_budget = limit // 2
    return limit, tile_budget


def _pick_tile_n(n, l_in, l_out, cinp, coutp, budget_bytes):
    """Largest divisor of n whose per-tile working set fits the budget.

    Footprint per batch row ~ double-buffered bf16 I/O tiles (x, y1p, ysc/y2)
    plus a few f32 register/VMEM copies of the activations.
    """
    io = 2 * 2 * ((l_in + 2) * cinp + (2 * l_out + 4) * coutp)   # bf16, dbl-buffered
    work = 8 * (l_out + 2) * coutp * 4                            # f32 working copies
    per_row = io + work
    target = max(1, min(n, budget_bytes // max(per_row, 1)))
    best = 1
    best_aligned = 0
    for d in range(1, target + 1):
        if n % d == 0:
            best = d
            if d % 8 == 0:
                best_aligned = d
    # prefer a sublane-aligned (multiple of 8) tile if it is not much smaller
    if best_aligned and best_aligned * 2 >= best:
        best = best_aligned
    # TODO(synk): for awkward / prime N, pad N with masked edge tiles instead of
    # falling back to tiny divisors; and add a second ("parallel") grid axis
    # over Lout so v7x's 2 TensorCores stay fed when N is small.
    return best


# --------------------------- pass A: conv1 (+ shortcut conv) ---------------------------
def _conv1_kernel(stride, has_shortcut, lout, *refs):
    if has_shortcut:
        x_ref, w1_ref, ws_ref, y1p_ref, ysc_ref, mom_ref = refs
    else:
        x_ref, w1_ref, y1p_ref, mom_ref = refs

    tn = x_ref.shape[0]
    cinp = x_ref.shape[2]
    coutp = y1p_ref.shape[2]
    rows = tn * lout
    inv_cnt = 1.0 / float(rows)

    # conv1 (k=3, stride s, pad 1) as 3 accumulated MXU matmuls over shifted
    # window loads straight from the ref (no 3x stacked-K slab).
    y1 = jnp.zeros((rows, coutp), jnp.float32)
    for k in range(3):
        tap = x_ref[:, _lds(k, lout, stride), :].reshape(rows, cinp)   # bf16
        y1 = y1 + jnp.dot(tap, w1_ref[k], preferred_element_type=jnp.float32)

    # per-tile mean-shifted moments (merged across tiles with Chan's formula)
    s1 = jnp.sum(y1, axis=0, keepdims=True)
    d1 = y1 - s1 * inv_cnt
    q1 = jnp.sum(d1 * d1, axis=0, keepdims=True)

    # store y1 pre-padded along L (zero border rows) so pass B needs no scratch
    zrow = jnp.zeros((tn, 1, coutp), y1p_ref.dtype)
    y1p_ref[:, 0:1, :] = zrow
    y1p_ref[:, lout + 1:lout + 2, :] = zrow
    y1p_ref[:, 1:lout + 1, :] = y1.reshape(tn, lout, coutp).astype(y1p_ref.dtype)

    if has_shortcut:
        xc = x_ref[:, _lds(1, lout, stride), :].reshape(rows, cinp)
        sc = jnp.dot(xc, ws_ref[...], preferred_element_type=jnp.float32)
        ysc_ref[...] = sc.reshape(tn, lout, coutp).astype(ysc_ref.dtype)
        s2 = jnp.sum(sc, axis=0, keepdims=True)
        d2 = sc - s2 * inv_cnt
        q2 = jnp.sum(d2 * d2, axis=0, keepdims=True)
        mom_ref[0] = jnp.concatenate([s1, q1, s2, q2], axis=0)        # (4, coutp)
    else:
        mom_ref[0] = jnp.concatenate([s1, q1], axis=0)                # (2, coutp)


# ------------------- pass B: BN1(scale/bias) + ReLU + conv2 ---------------------
def _conv2_kernel(lout, y1p_ref, s1_ref, b1_ref, w2_ref, y2_ref, mom_ref):
    tn = y1p_ref.shape[0]
    coutp = y1p_ref.shape[2]
    rows = tn * lout
    inv_cnt = 1.0 / float(rows)

    # fused BN1 (precomputed scale/bias) + ReLU on the pre-padded tile; the
    # conv2 "same"-padding rows must be zero AFTER BN+ReLU, so re-zero them.
    hp = jnp.maximum(y1p_ref[...].astype(jnp.float32) * s1_ref[...] + b1_ref[...], 0.0)
    l_idx = jax.lax.broadcasted_iota(jnp.int32, (lout + 2, coutp), 0)
    interior = (l_idx >= 1) & (l_idx <= lout)
    hp = jnp.where(interior[None, :, :], hp, 0.0).astype(jnp.bfloat16)

    y2 = jnp.zeros((rows, coutp), jnp.float32)
    for k in range(3):
        tap = hp[:, k:k + lout, :].reshape(rows, coutp)               # bf16
        y2 = y2 + jnp.dot(tap, w2_ref[k], preferred_element_type=jnp.float32)

    y2_ref[...] = y2.reshape(tn, lout, coutp).astype(y2_ref.dtype)
    s = jnp.sum(y2, axis=0, keepdims=True)
    d = y2 - s * inv_cnt
    q = jnp.sum(d * d, axis=0, keepdims=True)
    mom_ref[0] = jnp.concatenate([s, q], axis=0)                      # (2, coutp)


# ----------------- pass C: BN2 (+ BN_shortcut) + add + ReLU ---------------------
def _fuse_shortcut_kernel(cout, y2_ref, ysc_ref, s2_ref, b2_ref, ss_ref, bs_ref, o_ref):
    res = y2_ref[...].astype(jnp.float32) * s2_ref[...] + b2_ref[...]
    sc = ysc_ref[...].astype(jnp.float32) * ss_ref[...] + bs_ref[...]
    o_ref[...] = jnp.maximum(res + sc, 0.0)[:, :, :cout].astype(o_ref.dtype)


def _fuse_identity_kernel(cout, lout, y2_ref, x_ref, s2_ref, b2_ref, o_ref):
    res = y2_ref[...].astype(jnp.float32) * s2_ref[...] + b2_ref[...]
    sc = x_ref[:, 1:lout + 1, :].astype(jnp.float32)                  # identity shortcut
    o_ref[...] = jnp.maximum(res + sc, 0.0)[:, :, :cout].astype(o_ref.dtype)


# ------------------------------- wrapper glue -----------------------------------
def _stack_conv_w(w, cin, cout, cinp, coutp):
    """(Cout, Cin, K) PyTorch OIH -> (K, Cinp, Coutp) tap-major, lane-padded, bf16."""
    wt = jnp.transpose(w, (2, 1, 0)).astype(jnp.float32)              # (K, Cin, Cout)
    wt = jnp.pad(wt, ((0, 0), (0, cinp - cin), (0, coutp - cout)))
    return wt.astype(jnp.bfloat16)


def _pad_vec(v, cp):
    return jnp.pad(v.astype(jnp.float32), (0, cp - v.shape[0]))


def _bn_fold(s_tiles, q_tiles, count, gamma_p, beta_p):
    """Merge per-tile (sum, centered-sq-sum) with Chan's formula -> folded scale/bias."""
    n_tiles = s_tiles.shape[0]
    cnt_tile = count / n_tiles
    mean = jnp.sum(s_tiles, axis=0) / count
    m_tiles = s_tiles / cnt_tile
    m2 = jnp.sum(q_tiles, axis=0) + cnt_tile * jnp.sum((m_tiles - mean) ** 2, axis=0)
    var = jnp.maximum(m2 / count, 0.0)                                # biased variance
    scale = gamma_p * jax.lax.rsqrt(var + EPS)
    bias = beta_p - mean * scale
    return scale.reshape(1, 1, -1), bias.reshape(1, 1, -1)


@functools.partial(jax.jit, static_argnames=("stride",))
def basic_block_forward(x_ncl, params, stride=1):
    """x_ncl: (N, Cin, L) float32, PyTorch layout.  Returns (N, Cout, Lout)."""
    N, Cin, L = x_ncl.shape
    Cout = params["w1"].shape[0]
    has_shortcut = (stride != 1) or (Cin != Cout)
    Lout = (L - 1) // stride + 1
    Cinp = _round_up(Cin, LANE)
    Coutp = _round_up(Cout, LANE)

    # ---- layout glue: NCL -> NLC, channel pad to lane width, length pad by 1 ----
    # TODO(synk): a channels-last end-to-end model (and packing L-chunks into the
    # 128-lane axis for tiny C) would remove this transpose/pad round-trip.
    x_nlc = jnp.transpose(x_ncl, (0, 2, 1)).astype(jnp.float32)
    x_pad = jnp.pad(x_nlc, ((0, 0), (1, 1), (0, Cinp - Cin))).astype(jnp.bfloat16)

    w1s = _stack_conv_w(params["w1"], Cin, Cout, Cinp, Coutp)         # (3, Cinp, Coutp)
    w2s = _stack_conv_w(params["w2"], Cout, Cout, Coutp, Coutp)       # (3, Coutp, Coutp)

    g1 = _pad_vec(params["g1"], Coutp); b1 = _pad_vec(params["b1"], Coutp)
    g2 = _pad_vec(params["g2"], Coutp); b2 = _pad_vec(params["b2"], Coutp)

    vmem_limit, tile_budget = _vmem_budget()
    tn = _pick_tile_n(N, L, Lout, Cinp, Coutp, tile_budget)
    n_tiles = N // tn
    count = float(N * Lout)
    cparams = pltpu.CompilerParams(
        dimension_semantics=("parallel",),
        vmem_limit_bytes=vmem_limit,
    )

    # ------------------------------- pass A ------------------------------------
    mom_rows = 4 if has_shortcut else 2
    in_a = [x_pad, w1s]
    in_a_specs = [
        pl.BlockSpec((tn, L + 2, Cinp), lambda i: (i, 0, 0)),
        pl.BlockSpec((3, Cinp, Coutp), lambda i: (0, 0, 0)),
    ]
    out_a_shapes = [jax.ShapeDtypeStruct((N, Lout + 2, Coutp), jnp.bfloat16)]
    out_a_specs = [pl.BlockSpec((tn, Lout + 2, Coutp), lambda i: (i, 0, 0))]
    if has_shortcut:
        ws = _stack_conv_w(params["ws"], Cin, Cout, Cinp, Coutp)[0]   # (Cinp, Coutp)
        in_a.append(ws)
        in_a_specs.append(pl.BlockSpec((Cinp, Coutp), lambda i: (0, 0)))
        out_a_shapes.append(jax.ShapeDtypeStruct((N, Lout, Coutp), jnp.bfloat16))
        out_a_specs.append(pl.BlockSpec((tn, Lout, Coutp), lambda i: (i, 0, 0)))
    out_a_shapes.append(jax.ShapeDtypeStruct((n_tiles, mom_rows, Coutp), jnp.float32))
    out_a_specs.append(pl.BlockSpec((1, mom_rows, Coutp), lambda i: (i, 0, 0)))

    res_a = pl.pallas_call(
        functools.partial(_conv1_kernel, stride, has_shortcut, Lout),
        grid=(n_tiles,),
        in_specs=in_a_specs,
        out_specs=out_a_specs,
        out_shape=out_a_shapes,
        compiler_params=cparams,
    )(*in_a)
    if has_shortcut:
        y1p, ysc, mom_a = res_a
    else:
        y1p, mom_a = res_a

    scale1, bias1 = _bn_fold(mom_a[:, 0, :], mom_a[:, 1, :], count, g1, b1)
    if has_shortcut:
        gs = _pad_vec(params["gs"], Coutp); bs = _pad_vec(params["bs"], Coutp)
        scale_s, bias_s = _bn_fold(mom_a[:, 2, :], mom_a[:, 3, :], count, gs, bs)

    # ------------------------------- pass B ------------------------------------
    y2, mom_b = pl.pallas_call(
        functools.partial(_conv2_kernel, Lout),
        grid=(n_tiles,),
        in_specs=[
            pl.BlockSpec((tn, Lout + 2, Coutp), lambda i: (i, 0, 0)),
            pl.BlockSpec((1, 1, Coutp), lambda i: (0, 0, 0)),
            pl.BlockSpec((1, 1, Coutp), lambda i: (0, 0, 0)),
            pl.BlockSpec((3, Coutp, Coutp), lambda i: (0, 0, 0)),
        ],
        out_specs=[
            pl.BlockSpec((tn, Lout, Coutp), lambda i: (i, 0, 0)),
            pl.BlockSpec((1, 2, Coutp), lambda i: (i, 0, 0)),
        ],
        out_shape=[
            jax.ShapeDtypeStruct((N, Lout, Coutp), jnp.bfloat16),
            jax.ShapeDtypeStruct((n_tiles, 2, Coutp), jnp.float32),
        ],
        compiler_params=cparams,
    )(y1p, scale1, bias1, w2s)

    scale2, bias2 = _bn_fold(mom_b[:, 0, :], mom_b[:, 1, :], count, g2, b2)

    # ------------------------------- pass C ------------------------------------
    out_shape_c = jax.ShapeDtypeStruct((N, Lout, Cout), x_ncl.dtype)
    out_spec_c = pl.BlockSpec((tn, Lout, Cout), lambda i: (i, 0, 0))
    if has_shortcut:
        out_nlc = pl.pallas_call(
            functools.partial(_fuse_shortcut_kernel, Cout),
            grid=(n_tiles,),
            in_specs=[
                pl.BlockSpec((tn, Lout, Coutp), lambda i: (i, 0, 0)),
                pl.BlockSpec((tn, Lout, Coutp), lambda i: (i, 0, 0)),
                pl.BlockSpec((1, 1, Coutp), lambda i: (0, 0, 0)),
                pl.BlockSpec((1, 1, Coutp), lambda i: (0, 0, 0)),
                pl.BlockSpec((1, 1, Coutp), lambda i: (0, 0, 0)),
                pl.BlockSpec((1, 1, Coutp), lambda i: (0, 0, 0)),
            ],
            out_specs=out_spec_c,
            out_shape=out_shape_c,
            compiler_params=cparams,
        )(y2, ysc, scale2, bias2, scale_s, bias_s)
    else:
        # identity shortcut: no ysc round-trip; read x_pad directly (Lout == L,
        # Cinp == Coutp in this configuration) and skip the shortcut BN FMA.
        out_nlc = pl.pallas_call(
            functools.partial(_fuse_identity_kernel, Cout, Lout),
            grid=(n_tiles,),
            in_specs=[
                pl.BlockSpec((tn, Lout, Coutp), lambda i: (i, 0, 0)),
                pl.BlockSpec((tn, L + 2, Cinp), lambda i: (i, 0, 0)),
                pl.BlockSpec((1, 1, Coutp), lambda i: (0, 0, 0)),
                pl.BlockSpec((1, 1, Coutp), lambda i: (0, 0, 0)),
            ],
            out_specs=out_spec_c,
            out_shape=out_shape_c,
            compiler_params=cparams,
        )(y2, x_pad, scale2, bias2)

    # back to PyTorch NCL layout (real channels only were written)
    return jnp.transpose(out_nlc, (0, 2, 1))


# ------------------------------ pure-JAX reference ------------------------------
def _ref_forward(x, params, stride, has_shortcut):
    """Pure-JAX reference (NCL layout) mirroring the PyTorch forward."""
    def conv1d(x, w, s, pad):
        return jax.lax.conv_general_dilated(
            x, w, (s,), [(pad, pad)], dimension_numbers=("NCH", "OIH", "NCH"))

    def bn(x, g, b):
        mean = jnp.mean(x, axis=(0, 2), keepdims=True)
        var = jnp.mean((x - mean) ** 2, axis=(0, 2), keepdims=True)
        return g[None, :, None] * (x - mean) * jax.lax.rsqrt(var + EPS) + b[None, :, None]

    h = jax.nn.relu(bn(conv1d(x, params["w1"], stride, 1), params["g1"], params["b1"]))
    res = bn(conv1d(h, params["w2"], 1, 1), params["g2"], params["b2"])
    if has_shortcut:
        sc = bn(conv1d(x, params["ws"], stride, 0), params["gs"], params["bs"])
    else:
        sc = x
    return jax.nn.relu(res + sc)


if __name__ == "__main__":
    key = jax.random.PRNGKey(0)
    ks = jax.random.split(key, 20)

    def make_params(cin, cout, keys):
        return {
            "w1": 0.2 * jax.random.normal(keys[0], (cout, cin, 3), jnp.float32),
            "g1": 1.0 + 0.1 * jax.random.normal(keys[1], (cout,), jnp.float32),
            "b1": 0.1 * jax.random.normal(keys[2], (cout,), jnp.float32),
            "w2": 0.2 * jax.random.normal(keys[3], (cout, cout, 3), jnp.float32),
            "g2": 1.0 + 0.1 * jax.random.normal(keys[4], (cout,), jnp.float32),
            "b2": 0.1 * jax.random.normal(keys[5], (cout,), jnp.float32),
            "ws": 0.2 * jax.random.normal(keys[6], (cout, cin, 1), jnp.float32),
            "gs": 1.0 + 0.1 * jax.random.normal(keys[7], (cout,), jnp.float32),
            "bs": 0.1 * jax.random.normal(keys[8], (cout,), jnp.float32),
        }

    # bf16 MXU operands / bf16 HBM intermediates -> compare with a loose-but-
    # meaningful tolerance against the f32 reference.
    RTOL, ATOL = 5e-2, 1e-1

    # config 1: projection shortcut (Cin != Cout), stride = 1
    N, Cin, Cout, L, stride = 2, 4, 8, 16, 1
    params = make_params(Cin, Cout, ks[:9])
    x = jax.random.normal(ks[9], (N, Cin, L), jnp.float32)
    out = jax.block_until_ready(basic_block_forward(x, params, stride=stride))
    ref = jax.block_until_ready(_ref_forward(x, params, stride, True))
    np.testing.assert_allclose(np.asarray(out), np.asarray(ref), rtol=RTOL, atol=ATOL)

    # config 2: identity shortcut (Cin == Cout), stride = 1
    Cin2 = Cout2 = 8
    params2 = make_params(Cin2, Cout2, ks[10:19])
    x2 = jax.random.normal(ks[19], (N, Cin2, L), jnp.float32)
    out2 = jax.block_until_ready(basic_block_forward(x2, params2, stride=1))
    ref2 = jax.block_until_ready(_ref_forward(x2, params2, 1, False))
    np.testing.assert_allclose(np.asarray(out2), np.asarray(ref2), rtol=RTOL, atol=ATOL)

    print("KERNEL_OK")
</pallas_src>

<mosaic_0001>
module attributes {stable_mosaic.version = 11 : i64} {
  func.func @_conv1_kernel(%arg0: i32, %arg1: memref<2x18x128xbf16, #tpu.memory_space<vmem>>, %arg2: memref<3x128x128xbf16, #tpu.memory_space<vmem>>, %arg3: memref<128x128xbf16, #tpu.memory_space<vmem>>, %arg4: memref<2x18x128xbf16, #tpu.memory_space<vmem>>, %arg5: memref<2x16x128xbf16, #tpu.memory_space<vmem>>, %arg6: memref<1x4x128xf32, #tpu.memory_space<vmem>>) attributes {dimension_semantics = [#tpu.dimension_semantics<parallel>], iteration_bounds = array<i64: 1>, scalar_prefetch = 0 : i64, scratch_operands = 0 : i64, tpu.core_type = #tpu.core_type<tc>, window_params = [{transform_indices = @transform_0, window_bounds = array<i64: 2, 18, 128>}, {pipeline_mode = #tpu.pipeline_mode<synchronous>, transform_indices = @transform_1, window_bounds = array<i64: 3, 128, 128>}, {pipeline_mode = #tpu.pipeline_mode<synchronous>, transform_indices = @transform_2, window_bounds = array<i64: 128, 128>}, {transform_indices = @transform_3, window_bounds = array<i64: 2, 18, 128>}, {transform_indices = @transform_4, window_bounds = array<i64: 2, 16, 128>}, {transform_indices = @transform_5, window_bounds = array<i64: 1, 4, 128>}]} {
    %cst = arith.constant 0.000000e+00 : f32
    %0 = vector.broadcast %cst : f32 to vector<32x128xf32>
    %c0 = arith.constant 0 : index
    %c0_0 = arith.constant 0 : index
    %c0_1 = arith.constant 0 : index
    %1 = vector.load %arg1[%c0, %c0_0, %c0_1] : memref<2x18x128xbf16, #tpu.memory_space<vmem>>, vector<2x16x128xbf16>
    %2 = vector.shape_cast %1 : vector<2x16x128xbf16> to vector<32x128xbf16>
    %c0_2 = arith.constant 0 : index
    %c0_3 = arith.constant 0 : index
    %c0_4 = arith.constant 0 : index
    %3 = vector.load %arg2[%c0_2, %c0_3, %c0_4] : memref<3x128x128xbf16, #tpu.memory_space<vmem>>, vector<1x128x128xbf16>
    %4 = vector.shape_cast %3 : vector<1x128x128xbf16> to vector<128x128xbf16>
    %cst_5 = arith.constant dense<0.000000e+00> : vector<32x128xf32>
    %5 = tpu.matmul %2, %4, %cst_5 {dimension_numbers = #tpu.dot_dimension_numbers<[1], [0], [0], [1], [0, 0, 1, 1], [], []>} : vector<32x128xbf16>, vector<128x128xbf16>, vector<32x128xf32> -> vector<32x128xf32>
    %6 = arith.addf %0, %5 : vector<32x128xf32>
    %c0_6 = arith.constant 0 : index
    %c1 = arith.constant 1 : index
    %c0_7 = arith.constant 0 : index
    %7 = vector.load %arg1[%c0_6, %c1, %c0_7] : memref<2x18x128xbf16, #tpu.memory_space<vmem>>, vector<2x16x128xbf16>
    %8 = vector.shape_cast %7 : vector<2x16x128xbf16> to vector<32x128xbf16>
    %c1_8 = arith.constant 1 : index
    %c0_9 = arith.constant 0 : index
    %c0_10 = arith.constant 0 : index
    %9 = vector.load %arg2[%c1_8, %c0_9, %c0_10] : memref<3x128x128xbf16, #tpu.memory_space<vmem>>, vector<1x128x128xbf16>
    %10 = vector.shape_cast %9 : vector<1x128x128xbf16> to vector<128x128xbf16>
    %cst_11 = arith.constant dense<0.000000e+00> : vector<32x128xf32>
    %11 = tpu.matmul %8, %10, %cst_11 {dimension_numbers = #tpu.dot_dimension_numbers<[1], [0], [0], [1], [0, 0, 1, 1], [], []>} : vector<32x128xbf16>, vector<128x128xbf16>, vector<32x128xf32> -> vector<32x128xf32>
    %12 = arith.addf %6, %11 : vector<32x128xf32>
    %c0_12 = arith.constant 0 : index
    %c2 = arith.constant 2 : index
    %c0_13 = arith.constant 0 : index
    %13 = vector.load %arg1[%c0_12, %c2, %c0_13] : memref<2x18x128xbf16, #tpu.memory_space<vmem>>, vector<2x16x128xbf16>
    %14 = vector.shape_cast %13 : vector<2x16x128xbf16> to vector<32x128xbf16>
    %c2_14 = arith.constant 2 : index
    %c0_15 = arith.constant 0 : index
    %c0_16 = arith.constant 0 : index
    %15 = vector.load %arg2[%c2_14, %c0_15, %c0_16] : memref<3x128x128xbf16, #tpu.memory_space<vmem>>, vector<1x128x128xbf16>
    %16 = vector.shape_cast %15 : vector<1x128x128xbf16> to vector<128x128xbf16>
    %cst_17 = arith.constant dense<0.000000e+00> : vector<32x128xf32>
    %17 = tpu.matmul %14, %16, %cst_17 {dimension_numbers = #tpu.dot_dimension_numbers<[1], [0], [0], [1], [0, 0, 1, 1], [], []>} : vector<32x128xbf16>, vector<128x128xbf16>, vector<32x128xf32> -> vector<32x128xf32>
    %18 = arith.addf %12, %17 : vector<32x128xf32>
    %cst_18 = arith.constant dense<0.000000e+00> : vector<128xf32>
    %19 = vector.multi_reduction <add>, %18, %cst_18 [0] : vector<32x128xf32> to vector<128xf32>
    %20 = vector.shape_cast %19 : vector<128xf32> to vector<1x128xf32>
    %cst_19 = arith.constant 3.125000e-02 : f32
    %21 = vector.broadcast %cst_19 : f32 to vector<1x128xf32>
    %22 = arith.mulf %20, %21 : vector<1x128xf32>
    %23 = vector.broadcast %22 : vector<1x128xf32> to vector<32x128xf32>
    %24 = arith.subf %18, %23 : vector<32x128xf32>
    %25 = arith.mulf %24, %24 : vector<32x128xf32>
    %cst_20 = arith.constant dense<0.000000e+00> : vector<128xf32>
    %26 = vector.multi_reduction <add>, %25, %cst_20 [0] : vector<32x128xf32> to vector<128xf32>
    %27 = vector.shape_cast %26 : vector<128xf32> to vector<1x128xf32>
    %cst_21 = arith.constant 0.000000e+00 : bf16
    %28 = vector.broadcast %cst_21 : bf16 to vector<2x1x128xbf16>
    %c0_22 = arith.constant 0 : index
    %c0_23 = arith.constant 0 : index
    %c0_24 = arith.constant 0 : index
    %29 = vector.load %arg4[%c0_22, %c0_23, %c0_24] : memref<2x18x128xbf16, #tpu.memory_space<vmem>>, vector<2x1x128xbf16>
    tpu.vector_store %arg4[%c0_22, %c0_23, %c0_24], %28 {strides = array<i32>} : memref<2x18x128xbf16, #tpu.memory_space<vmem>>, vector<2x1x128xbf16>,
    %c0_25 = arith.constant 0 : index
    %c17 = arith.constant 17 : index
    %c0_26 = arith.constant 0 : index
    %30 = vector.load %arg4[%c0_25, %c17, %c0_26] : memref<2x18x128xbf16, #tpu.memory_space<vmem>>, vector<2x1x128xbf16>
    tpu.vector_store %arg4[%c0_25, %c17, %c0_26], %28 {strides = array<i32>} : memref<2x18x128xbf16, #tpu.memory_space<vmem>>, vector<2x1x128xbf16>,
    %31 = vector.shape_cast %18 : vector<32x128xf32> to vector<2x16x128xf32>
    %32 = arith.truncf %31 : vector<2x16x128xf32> to vector<2x16x128xbf16>
    %c0_27 = arith.constant 0 : index
    %c1_28 = arith.constant 1 : index
    %c0_29 = arith.constant 0 : index
    %33 = vector.load %arg4[%c0_27, %c1_28, %c0_29] : memref<2x18x128xbf16, #tpu.memory_space<vmem>>, vector<2x16x128xbf16>
    tpu.vector_store %arg4[%c0_27, %c1_28, %c0_29], %32 {strides = array<i32>} : memref<2x18x128xbf16, #tpu.memory_space<vmem>>, vector<2x16x128xbf16>,
    %c0_30 = arith.constant 0 : index
    %c1_31 = arith.constant 1 : index
    %c0_32 = arith.constant 0 : index
    %34 = vector.load %arg1[%c0_30, %c1_31, %c0_32] : memref<2x18x128xbf16, #tpu.memory_space<vmem>>, vector<2x16x128xbf16>
    %35 = vector.shape_cast %34 : vector<2x16x128xbf16> to vector<32x128xbf16>
    %c0_33 = arith.constant 0 : index
    %c0_34 = arith.constant 0 : index
    %36 = vector.load %arg3[%c0_33, %c0_34] : memref<128x128xbf16, #tpu.memory_space<vmem>>, vector<128x128xbf16>
    %cst_35 = arith.constant dense<0.000000e+00> : vector<32x128xf32>
    %37 = tpu.matmul %35, %36, %cst_35 {dimension_numbers = #tpu.dot_dimension_numbers<[1], [0], [0], [1], [0, 0, 1, 1], [], []>} : vector<32x128xbf16>, vector<128x128xbf16>, vector<32x128xf32> -> vector<32x128xf32>
    %38 = vector.shape_cast %37 : vector<32x128xf32> to vector<2x16x128xf32>
    %39 = arith.truncf %38 : vector<2x16x128xf32> to vector<2x16x128xbf16>
    %c0_36 = arith.constant 0 : index
    %c0_37 = arith.constant 0 : index
    %c0_38 = arith.constant 0 : index
    %40 = vector.load %arg5[%c0_36, %c0_37, %c0_38] : memref<2x16x128xbf16, #tpu.memory_space<vmem>>, vector<2x16x128xbf16>
    tpu.vector_store %arg5[%c0_36, %c0_37, %c0_38], %39 {strides = array<i32>} : memref<2x16x128xbf16, #tpu.memory_space<vmem>>, vector<2x16x128xbf16>,
    %cst_39 = arith.constant dense<0.000000e+00> : vector<128xf32>
    %41 = vector.multi_reduction <add>, %37, %cst_39 [0] : vector<32x128xf32> to vector<128xf32>
    %42 = vector.shape_cast %41 : vector<128xf32> to vector<1x128xf32>
    %cst_40 = arith.constant 3.125000e-02 : f32
    %43 = vector.broadcast %cst_40 : f32 to vector<1x128xf32>
    %44 = arith.mulf %42, %43 : vector<1x128xf32>
    %45 = vector.broadcast %44 : vector<1x128xf32> to vector<32x128xf32>
    %46 = arith.subf %37, %45 : vector<32x128xf32>
    %47 = arith.mulf %46, %46 : vector<32x128xf32>
    %cst_41 = arith.constant dense<0.000000e+00> : vector<128xf32>
    %48 = vector.multi_reduction <add>, %47, %cst_41 [0] : vector<32x128xf32> to vector<128xf32>
    %49 = vector.shape_cast %48 : vector<128xf32> to vector<1x128xf32>
    %50 = tpu.concatenate %20, %27, %42, %49 in 0 : vector<1x128xf32>, vector<1x128xf32>, vector<1x128xf32>, vector<1x128xf32> -> vector<4x128xf32>
    %c0_42 = arith.constant 0 : index
    %c0_43 = arith.constant 0 : index
    %c0_44 = arith.constant 0 : index
    %51 = vector.load %arg6[%c0_42, %c0_43, %c0_44] : memref<1x4x128xf32, #tpu.memory_space<vmem>>, vector<1x4x128xf32>
    %52 = vector.shape_cast %51 : vector<1x4x128xf32> to vector<4x128xf32>
    %53 = vector.shape_cast %50 : vector<4x128xf32> to vector<1x4x128xf32>
    tpu.vector_store %arg6[%c0_42, %c0_43, %c0_44], %53 {strides = array<i32>} : memref<1x4x128xf32, #tpu.memory_space<vmem>>, vector<1x4x128xf32>,
    return
  }
  func.func @transform_0(%arg0: i32) -> (i32, i32, i32) {
    %c0_i32 = arith.constant 0 : i32
    %c0_i32_0 = arith.constant 0 : i32
    %c0_i32_1 = arith.constant 0 : i32
    return %arg0, %c0_i32, %c0_i32_0 : i32, i32, i32
  }
  func.func @transform_1(%arg0: i32) -> (i32, i32, i32) {
    %c0_i32 = arith.constant 0 : i32
    %c0_i32_0 = arith.constant 0 : i32
    %c0_i32_1 = arith.constant 0 : i32
    %c0_i32_2 = arith.constant 0 : i32
    return %c0_i32, %c0_i32_0, %c0_i32_1 : i32, i32, i32
  }
  func.func @transform_2(%arg0: i32) -> (i32, i32) {
    %c0_i32 = arith.constant 0 : i32
    %c0_i32_0 = arith.constant 0 : i32
    %c0_i32_1 = arith.constant 0 : i32
    return %c0_i32, %c0_i32_0 : i32, i32
  }
  func.func @transform_3(%arg0: i32) -> (i32, i32, i32) {
    %c0_i32 = arith.constant 0 : i32
    %c0_i32_0 = arith.constant 0 : i32
    %c0_i32_1 = arith.constant 0 : i32
    return %arg0, %c0_i32, %c0_i32_0 : i32, i32, i32
  }
  func.func @transform_4(%arg0: i32) -> (i32, i32, i32) {
    %c0_i32 = arith.constant 0 : i32
    %c0_i32_0 = arith.constant 0 : i32
    %c0_i32_1 = arith.constant 0 : i32
    return %arg0, %c0_i32, %c0_i32_0 : i32, i32, i32
  }
  func.func @transform_5(%arg0: i32) -> (i32, i32, i32) {
    %c0_i32 = arith.constant 0 : i32
    %c0_i32_0 = arith.constant 0 : i32
    %c0_i32_1 = arith.constant 0 : i32
    return %arg0, %c0_i32, %c0_i32_0 : i32, i32, i32
  }
}

module attributes {stable_mosaic.version = 11 : i64} {
  func.func @_conv2_kernel(%arg0: i32, %arg1: memref<2x18x128xbf16, #tpu.memory_space<vmem>>, %arg2: memref<1x1x128xf32, #tpu.memory_space<vmem>>, %arg3: memref<1x1x128xf32, #tpu.memory_space<vmem>>, %arg4: memref<3x128x128xbf16, #tpu.memory_space<vmem>>, %arg5: memref<2x16x128xbf16, #tpu.memory_space<vmem>>, %arg6: memref<1x2x128xf32, #tpu.memory_space<vmem>>) attributes {dimension_semantics = [#tpu.dimension_semantics<parallel>], iteration_bounds = array<i64: 1>, scalar_prefetch = 0 : i64, scratch_operands = 0 : i64, tpu.core_type = #tpu.core_type<tc>, window_params = [{transform_indices = @transform_0, window_bounds = array<i64: 2, 18, 128>}, {pipeline_mode = #tpu.pipeline_mode<synchronous>, transform_indices = @transform_1, window_bounds = array<i64: 1, 1, 128>}, {pipeline_mode = #tpu.pipeline_mode<synchronous>, transform_indices = @transform_2, window_bounds = array<i64: 1, 1, 128>}, {pipeline_mode = #tpu.pipeline_mode<synchronous>, transform_indices = @transform_3, window_bounds = array<i64: 3, 128, 128>}, {transform_indices = @transform_4, window_bounds = array<i64: 2, 16, 128>}, {transform_indices = @transform_5, window_bounds = array<i64: 1, 2, 128>}]} {
    %c0 = arith.constant 0 : index
    %c0_0 = arith.constant 0 : index
    %c0_1 = arith.constant 0 : index
    %0 = vector.load %arg1[%c0, %c0_0, %c0_1] : memref<2x18x128xbf16, #tpu.memory_space<vmem>>, vector<2x18x128xbf16>
    %1 = arith.extf %0 : vector<2x18x128xbf16> to vector<2x18x128xf32>
    %c0_2 = arith.constant 0 : index
    %c0_3 = arith.constant 0 : index
    %c0_4 = arith.constant 0 : index
    %2 = vector.load %arg2[%c0_2, %c0_3, %c0_4] : memref<1x1x128xf32, #tpu.memory_space<vmem>>, vector<1x1x128xf32>
    %3 = vector.broadcast %2 : vector<1x1x128xf32> to vector<2x18x128xf32>
    %4 = arith.mulf %1, %3 : vector<2x18x128xf32>
    %c0_5 = arith.constant 0 : index
    %c0_6 = arith.constant 0 : index
    %c0_7 = arith.constant 0 : index
    %5 = vector.load %arg3[%c0_5, %c0_6, %c0_7] : memref<1x1x128xf32, #tpu.memory_space<vmem>>, vector<1x1x128xf32>
    %6 = vector.broadcast %5 : vector<1x1x128xf32> to vector<2x18x128xf32>
    %7 = arith.addf %4, %6 : vector<2x18x128xf32>
    %cst = arith.constant 0.000000e+00 : f32
    %8 = vector.broadcast %cst : f32 to vector<2x18x128xf32>
    %9 = arith.maximumf %7, %8 : vector<2x18x128xf32>
    %10 = tpu.iota {dimensions = array<i32: 0>} : vector<18x128xi32>
    %c1_i32 = arith.constant 1 : i32
    %11 = vector.broadcast %c1_i32 : i32 to vector<18x128xi32>
    %12 = arith.cmpi sge, %10, %11 : vector<18x128xi32>
    %c16_i32 = arith.constant 16 : i32
    %13 = vector.broadcast %c16_i32 : i32 to vector<18x128xi32>
    %14 = arith.cmpi sle, %10, %13 : vector<18x128xi32>
    %15 = arith.andi %12, %14 : vector<18x128xi1>
    %16 = vector.shape_cast %15 : vector<18x128xi1> to vector<1x18x128xi1>
    %cst_8 = arith.constant 0.000000e+00 : f32
    %17 = vector.shape_cast %16 : vector<1x18x128xi1> to vector<1x18x128xi1>
    %18 = vector.broadcast %17 : vector<1x18x128xi1> to vector<2x18x128xi1>
    %19 = vector.broadcast %cst_8 : f32 to vector<2x18x128xf32>
    %20 = arith.select %18, %9, %19 : vector<2x18x128xi1>, vector<2x18x128xf32>
    %21 = arith.truncf %20 : vector<2x18x128xf32> to vector<2x18x128xbf16>
    %cst_9 = arith.constant 0.000000e+00 : f32
    %22 = vector.broadcast %cst_9 : f32 to vector<32x128xf32>
    %23 = vector.extract_strided_slice %21 {offsets = [0, 0, 0], sizes = [2, 16, 128], strides = [1, 1, 1]} : vector<2x18x128xbf16> to vector<2x16x128xbf16>
    %24 = vector.shape_cast %23 : vector<2x16x128xbf16> to vector<32x128xbf16>
    %c0_10 = arith.constant 0 : index
    %c0_11 = arith.constant 0 : index
    %c0_12 = arith.constant 0 : index
    %25 = vector.load %arg4[%c0_10, %c0_11, %c0_12] : memref<3x128x128xbf16, #tpu.memory_space<vmem>>, vector<1x128x128xbf16>
    %26 = vector.shape_cast %25 : vector<1x128x128xbf16> to vector<128x128xbf16>
    %cst_13 = arith.constant dense<0.000000e+00> : vector<32x128xf32>
    %27 = tpu.matmul %24, %26, %cst_13 {dimension_numbers = #tpu.dot_dimension_numbers<[1], [0], [0], [1], [0, 0, 1, 1], [], []>} : vector<32x128xbf16>, vector<128x128xbf16>, vector<32x128xf32> -> vector<32x128xf32>
    %28 = arith.addf %22, %27 : vector<32x128xf32>
    %29 = vector.extract_strided_slice %21 {offsets = [0, 1, 0], sizes = [2, 16, 128], strides = [1, 1, 1]} : vector<2x18x128xbf16> to vector<2x16x128xbf16>
    %30 = vector.shape_cast %29 : vector<2x16x128xbf16> to vector<32x128xbf16>
    %c1 = arith.constant 1 : index
    %c0_14 = arith.constant 0 : index
    %c0_15 = arith.constant 0 : index
    %31 = vector.load %arg4[%c1, %c0_14, %c0_15] : memref<3x128x128xbf16, #tpu.memory_space<vmem>>, vector<1x128x128xbf16>
    %32 = vector.shape_cast %31 : vector<1x128x128xbf16> to vector<128x128xbf16>
    %cst_16 = arith.constant dense<0.000000e+00> : vector<32x128xf32>
    %33 = tpu.matmul %30, %32, %cst_16 {dimension_numbers = #tpu.dot_dimension_numbers<[1], [0], [0], [1], [0, 0, 1, 1], [], []>} : vector<32x128xbf16>, vector<128x128xbf16>, vector<32x128xf32> -> vector<32x128xf32>
    %34 = arith.addf %28, %33 : vector<32x128xf32>
    %35 = vector.extract_strided_slice %21 {offsets = [0, 2, 0], sizes = [2, 16, 128], strides = [1, 1, 1]} : vector<2x18x128xbf16> to vector<2x16x128xbf16>
    %36 = vector.shape_cast %35 : vector<2x16x128xbf16> to vector<32x128xbf16>
    %c2 = arith.constant 2 : index
    %c0_17 = arith.constant 0 : index
    %c0_18 = arith.constant 0 : index
    %37 = vector.load %arg4[%c2, %c0_17, %c0_18] : memref<3x128x128xbf16, #tpu.memory_space<vmem>>, vector<1x128x128xbf16>
    %38 = vector.shape_cast %37 : vector<1x128x128xbf16> to vector<128x128xbf16>
    %cst_19 = arith.constant dense<0.000000e+00> : vector<32x128xf32>
    %39 = tpu.matmul %36, %38, %cst_19 {dimension_numbers = #tpu.dot_dimension_numbers<[1], [0], [0], [1], [0, 0, 1, 1], [], []>} : vector<32x128xbf16>, vector<128x128xbf16>, vector<32x128xf32> -> vector<32x128xf32>
    %40 = arith.addf %34, %39 : vector<32x128xf32>
    %41 = vector.shape_cast %40 : vector<32x128xf32> to vector<2x16x128xf32>
    %42 = arith.truncf %41 : vector<2x16x128xf32> to vector<2x16x128xbf16>
    %c0_20 = arith.constant 0 : index
    %c0_21 = arith.constant 0 : index
    %c0_22 = arith.constant 0 : index
    %43 = vector.load %arg5[%c0_20, %c0_21, %c0_22] : memref<2x16x128xbf16, #tpu.memory_space<vmem>>, vector<2x16x128xbf16>
    tpu.vector_store %arg5[%c0_20, %c0_21, %c0_22], %42 {strides = array<i32>} : memref<2x16x128xbf16, #tpu.memory_space<vmem>>, vector<2x16x128xbf16>,
    %cst_23 = arith.constant dense<0.000000e+00> : vector<128xf32>
    %44 = vector.multi_reduction <add>, %40, %cst_23 [0] : vector<32x128xf32> to vector<128xf32>
    %45 = vector.shape_cast %44 : vector<128xf32> to vector<1x128xf32>
    %cst_24 = arith.constant 3.125000e-02 : f32
    %46 = vector.broadcast %cst_24 : f32 to vector<1x128xf32>
    %47 = arith.mulf %45, %46 : vector<1x128xf32>
    %48 = vector.broadcast %47 : vector<1x128xf32> to vector<32x128xf32>
    %49 = arith.subf %40, %48 : vector<32x128xf32>
    %50 = arith.mulf %49, %49 : vector<32x128xf32>
    %cst_25 = arith.constant dense<0.000000e+00> : vector<128xf32>
    %51 = vector.multi_reduction <add>, %50, %cst_25 [0] : vector<32x128xf32> to vector<128xf32>
    %52 = vector.shape_cast %51 : vector<128xf32> to vector<1x128xf32>
    %53 = tpu.concatenate %45, %52 in 0 : vector<1x128xf32>, vector<1x128xf32> -> vector<2x128xf32>
    %c0_26 = arith.constant 0 : index
    %c0_27 = arith.constant 0 : index
    %c0_28 = arith.constant 0 : index
    %54 = vector.load %arg6[%c0_26, %c0_27, %c0_28] : memref<1x2x128xf32, #tpu.memory_space<vmem>>, vector<1x2x128xf32>
    %55 = vector.shape_cast %54 : vector<1x2x128xf32> to vector<2x128xf32>
    %56 = vector.shape_cast %53 : vector<2x128xf32> to vector<1x2x128xf32>
    tpu.vector_store %arg6[%c0_26, %c0_27, %c0_28], %56 {strides = array<i32>} : memref<1x2x128xf32, #tpu.memory_space<vmem>>, vector<1x2x128xf32>,
    return
  }
  func.func @transform_0(%arg0: i32) -> (i32, i32, i32) {
    %c0_i32 = arith.constant 0 : i32
    %c0_i32_0 = arith.constant 0 : i32
    %c0_i32_1 = arith.constant 0 : i32
    return %arg0, %c0_i32, %c0_i32_0 : i32, i32, i32
  }
  func.func @transform_1(%arg0: i32) -> (i32, i32, i32) {
    %c0_i32 = arith.constant 0 : i32
    %c0_i32_0 = arith.constant 0 : i32
    %c0_i32_1 = arith.constant 0 : i32
    %c0_i32_2 = arith.constant 0 : i32
    return %c0_i32, %c0_i32_0, %c0_i32_1 : i32, i32, i32
  }
  func.func @transform_2(%arg0: i32) -> (i32, i32, i32) {
    %c0_i32 = arith.constant 0 : i32
    %c0_i32_0 = arith.constant 0 : i32
    %c0_i32_1 = arith.constant 0 : i32
    %c0_i32_2 = arith.constant 0 : i32
    return %c0_i32, %c0_i32_0, %c0_i32_1 : i32, i32, i32
  }
  func.func @transform_3(%arg0: i32) -> (i32, i32, i32) {
    %c0_i32 = arith.constant 0 : i32
    %c0_i32_0 = arith.constant 0 : i32
    %c0_i32_1 = arith.constant 0 : i32
    %c0_i32_2 = arith.constant 0 : i32
    return %c0_i32, %c0_i32_0, %c0_i32_1 : i32, i32, i32
  }
  func.func @transform_4(%arg0: i32) -> (i32, i32, i32) {
    %c0_i32 = arith.constant 0 : i32
    %c0_i32_0 = arith.constant 0 : i32
    %c0_i32_1 = arith.constant 0 : i32
    return %arg0, %c0_i32, %c0_i32_0 : i32, i32, i32
  }
  func.func @transform_5(%arg0: i32) -> (i32, i32, i32) {
    %c0_i32 = arith.constant 0 : i32
    %c0_i32_0 = arith.constant 0 : i32
    %c0_i32_1 = arith.constant 0 : i32
    return %arg0, %c0_i32, %c0_i32_0 : i32, i32, i32
  }
}

module attributes {stable_mosaic.version = 11 : i64} {
  func.func @_fuse_shortcut_kernel(%arg0: i32, %arg1: memref<2x16x128xbf16, #tpu.memory_space<vmem>>, %arg2: memref<2x16x128xbf16, #tpu.memory_space<vmem>>, %arg3: memref<1x1x128xf32, #tpu.memory_space<vmem>>, %arg4: memref<1x1x128xf32, #tpu.memory_space<vmem>>, %arg5: memref<1x1x128xf32, #tpu.memory_space<vmem>>, %arg6: memref<1x1x128xf32, #tpu.memory_space<vmem>>, %arg7: memref<2x16x8xf32, #tpu.memory_space<vmem>>) attributes {dimension_semantics = [#tpu.dimension_semantics<parallel>], iteration_bounds = array<i64: 1>, scalar_prefetch = 0 : i64, scratch_operands = 0 : i64, tpu.core_type = #tpu.core_type<tc>, window_params = [{transform_indices = @transform_0, window_bounds = array<i64: 2, 16, 128>}, {transform_indices = @transform_1, window_bounds = array<i64: 2, 16, 128>}, {pipeline_mode = #tpu.pipeline_mode<synchronous>, transform_indices = @transform_2, window_bounds = array<i64: 1, 1, 128>}, {pipeline_mode = #tpu.pipeline_mode<synchronous>, transform_indices = @transform_3, window_bounds = array<i64: 1, 1, 128>}, {pipeline_mode = #tpu.pipeline_mode<synchronous>, transform_indices = @transform_4, window_bounds = array<i64: 1, 1, 128>}, {pipeline_mode = #tpu.pipeline_mode<synchronous>, transform_indices = @transform_5, window_bounds = array<i64: 1, 1, 128>}, {transform_indices = @transform_6, window_bounds = array<i64: 2, 16, 8>}]} {
    %c0 = arith.constant 0 : index
    %c0_0 = arith.constant 0 : index
    %c0_1 = arith.constant 0 : index
    %0 = vector.load %arg1[%c0, %c0_0, %c0_1] : memref<2x16x128xbf16, #tpu.memory_space<vmem>>, vector<2x16x128xbf16>
    %1 = arith.extf %0 : vector<2x16x128xbf16> to vector<2x16x128xf32>
    %c0_2 = arith.constant 0 : index
    %c0_3 = arith.constant 0 : index
    %c0_4 = arith.constant 0 : index
    %2 = vector.load %arg3[%c0_2, %c0_3, %c0_4] : memref<1x1x128xf32, #tpu.memory_space<vmem>>, vector<1x1x128xf32>
    %3 = vector.broadcast %2 : vector<1x1x128xf32> to vector<2x16x128xf32>
    %4 = arith.mulf %1, %3 : vector<2x16x128xf32>
    %c0_5 = arith.constant 0 : index
    %c0_6 = arith.constant 0 : index
    %c0_7 = arith.constant 0 : index
    %5 = vector.load %arg4[%c0_5, %c0_6, %c0_7] : memref<1x1x128xf32, #tpu.memory_space<vmem>>, vector<1x1x128xf32>
    %6 = vector.broadcast %5 : vector<1x1x128xf32> to vector<2x16x128xf32>
    %7 = arith.addf %4, %6 : vector<2x16x128xf32>
    %c0_8 = arith.constant 0 : index
    %c0_9 = arith.constant 0 : index
    %c0_10 = arith.constant 0 : index
    %8 = vector.load %arg2[%c0_8, %c0_9, %c0_10] : memref<2x16x128xbf16, #tpu.memory_space<vmem>>, vector<2x16x128xbf16>
    %9 = arith.extf %8 : vector<2x16x128xbf16> to vector<2x16x128xf32>
    %c0_11 = arith.constant 0 : index
    %c0_12 = arith.constant 0 : index
    %c0_13 = arith.constant 0 : index
    %10 = vector.load %arg5[%c0_11, %c0_12, %c0_13] : memref<1x1x128xf32, #tpu.memory_space<vmem>>, vector<1x1x128xf32>
    %11 = vector.broadcast %10 : vector<1x1x128xf32> to vector<2x16x128xf32>
    %12 = arith.mulf %9, %11 : vector<2x16x128xf32>
    %c0_14 = arith.constant 0 : index
    %c0_15 = arith.constant 0 : index
    %c0_16 = arith.constant 0 : index
    %13 = vector.load %arg6[%c0_14, %c0_15, %c0_16] : memref<1x1x128xf32, #tpu.memory_space<vmem>>, vector<1x1x128xf32>
    %14 = vector.broadcast %13 : vector<1x1x128xf32> to vector<2x16x128xf32>
    %15 = arith.addf %12, %14 : vector<2x16x128xf32>
    %16 = arith.addf %7, %15 : vector<2x16x128xf32>
    %cst = arith.constant 0.000000e+00 : f32
    %17 = vector.broadcast %cst : f32 to vector<2x16x128xf32>
    %18 = arith.maximumf %16, %17 : vector<2x16x128xf32>
    %19 = vector.extract_strided_slice %18 {offsets = [0, 0, 0], sizes = [2, 16, 8], strides = [1, 1, 1]} : vector<2x16x128xf32> to vector<2x16x8xf32>
    %c0_17 = arith.constant 0 : index
    %c0_18 = arith.constant 0 : index
    %c0_19 = arith.constant 0 : index
    %20 = vector.load %arg7[%c0_17, %c0_18, %c0_19] : memref<2x16x8xf32, #tpu.memory_space<vmem>>, vector<2x16x8xf32>
    tpu.vector_store %arg7[%c0_17, %c0_18, %c0_19], %19 {strides = array<i32>} : memref<2x16x8xf32, #tpu.memory_space<vmem>>, vector<2x16x8xf32>,
    return
  }
  func.func @transform_0(%arg0: i32) -> (i32, i32, i32) {
    %c0_i32 = arith.constant 0 : i32
    %c0_i32_0 = arith.constant 0 : i32
    %c0_i32_1 = arith.constant 0 : i32
    return %arg0, %c0_i32, %c0_i32_0 : i32, i32, i32
  }
  func.func @transform_1(%arg0: i32) -> (i32, i32, i32) {
    %c0_i32 = arith.constant 0 : i32
    %c0_i32_0 = arith.constant 0 : i32
    %c0_i32_1 = arith.constant 0 : i32
    return %arg0, %c0_i32, %c0_i32_0 : i32, i32, i32
  }
  func.func @transform_2(%arg0: i32) -> (i32, i32, i32) {
    %c0_i32 = arith.constant 0 : i32
    %c0_i32_0 = arith.constant 0 : i32
    %c0_i32_1 = arith.constant 0 : i32
    %c0_i32_2 = arith.constant 0 : i32
    return %c0_i32, %c0_i32_0, %c0_i32_1 : i32, i32, i32
  }
  func.func @transform_3(%arg0: i32) -> (i32, i32, i32) {
    %c0_i32 = arith.constant 0 : i32
    %c0_i32_0 = arith.constant 0 : i32
    %c0_i32_1 = arith.constant 0 : i32
    %c0_i32_2 = arith.constant 0 : i32
    return %c0_i32, %c0_i32_0, %c0_i32_1 : i32, i32, i32
  }
  func.func @transform_4(%arg0: i32) -> (i32, i32, i32) {
    %c0_i32 = arith.constant 0 : i32
    %c0_i32_0 = arith.constant 0 : i32
    %c0_i32_1 = arith.constant 0 : i32
    %c0_i32_2 = arith.constant 0 : i32
    return %c0_i32, %c0_i32_0, %c0_i32_1 : i32, i32, i32
  }
  func.func @transform_5(%arg0: i32) -> (i32, i32, i32) {
    %c0_i32 = arith.constant 0 : i32
    %c0_i32_0 = arith.constant 0 : i32
    %c0_i32_1 = arith.constant 0 : i32
    %c0_i32_2 = arith.constant 0 : i32
    return %c0_i32, %c0_i32_0, %c0_i32_1 : i32, i32, i32
  }
  func.func @transform_6(%arg0: i32) -> (i32, i32, i32) {
    %c0_i32 = arith.constant 0 : i32
    %c0_i32_0 = arith.constant 0 : i32
    %c0_i32_1 = arith.constant 0 : i32
    return %arg0, %c0_i32, %c0_i32_0 : i32, i32, i32
  }
}

</mosaic_0001>

<bundles_post_ra>
// kernel: basic_block_forward.5
= control target key start
LH: loop header
LB: loop body
LE: loop exit
PB: predicated region body
PF: predicated region fallthrough
CT: control target
= control target key end

     0   :  { %vm91_vm0 = vcmask 64512   ;;  %s193_s0 = inlined_call_operand.vmem [shape: bf16[2,16,128], index: 0, kind: input, shape index: {}]   ;;  %s194_s1 = inlined_call_operand.vmem [shape: bf16[2,16,128], index: 1, kind: input, shape index: {}]   ;;  %s195_s2 = inlined_call_operand.vmem [shape: f32[1,1,128], index: 2, kind: input, shape index: {}]   ;;  %s196_s3 = inlined_call_operand.vmem [shape: f32[1,1,128], index: 3, kind: input, shape index: {}]   ;;  %s197_s4 = inlined_call_operand.vmem [shape: f32[1,1,128], index: 4, kind: input, shape index: {}]   ;;  %s198_s5 = inlined_call_operand.vmem [shape: f32[1,1,128], index: 5, kind: input, shape index: {}]   ;;  %s199_s6 = inlined_call_operand.vmem [shape: f32[2,16,8], index: 6, kind: output, shape index: {}]  }
   0x1   :  { %v105_v0 = vld [vmem:[%s193_s0] sm:$0xff]   ;;  %v120_v9 = vld [vmem:[%s193_s0 + $0x8] sm:$0xff]  }
   0x2   :  { %v100_v1 = vld [vmem:[%s195_s2] ss:$0 sm:$0xff]  ;;  %v106_v2 = vunpack.c.l.bf16 %v105_v0  ;;  %v107_v5 = vunpack.c.h.bf16 %v105_v0  ;;  %v121_v10 = vld [vmem:[%s194_s1 + $0x8] sm:$0xff]   ;;  %v110_v14 = vunpack.c.l.bf16 %v120_v9  ;;  %v111_v18 = vunpack.c.h.bf16 %v120_v9 }
   0x3   :  { %v113_v3 = vld [vmem:[%s194_s1] sm:$0xff]   ;;  %v118_v15 = vunpack.c.l.bf16 %v121_v10  ;;  %v119_v19 = vunpack.c.h.bf16 %v121_v10 }
   0x4   :  { %v102_v4 = vld [vmem:[%s197_s4] ss:$0 sm:$0xff]  ;;  %v114_v7 = vunpack.c.l.bf16 %v113_v3  ;;  %v115_v8 = vunpack.c.h.bf16 %v113_v3  ;;  %v38_v11 = vmul.f32 %v106_v2, %v100_v1  ;;  %v39_v13 = vmul.f32 %v107_v5, %v100_v1 }
   0x5   :  { %v101_v6 = vld [vmem:[%s196_s3] ss:$0 sm:$0xff]  ;;  %v40_v22 = vmul.f32 %v110_v14, %v100_v1  ;;  %v70_v23 = vmul.f32 %v118_v15, %v102_v4  ;;  %v41_v26 = vmul.f32 %v111_v18, %v100_v1  ;;  %v71_v27 = vmul.f32 %v119_v19, %v102_v4 }
   0x6   :  { %v103_v12 = vld [vmem:[%s198_s5] ss:$0 sm:$0xff]  ;;  %v68_v16 = vmul.f32 %v114_v7, %v102_v4  ;;  %v69_v17 = vmul.f32 %v115_v8, %v102_v4  ;;  %v49_v20 = vadd.f32 %v101_v6, %v38_v11  ;;  %v50_v21 = vadd.f32 %v101_v6, %v39_v13 }
   0x7   :  { %v51_v28 = vadd.f32 %v101_v6, %v40_v22  ;;  %v81_v29 = vadd.f32 %v103_v12, %v70_v23  ;;  %v52_v32 = vadd.f32 %v101_v6, %v41_v26  ;;  %v82_v33 = vadd.f32 %v103_v12, %v71_v27 }
   0x8   :  { %v79_v24 = vadd.f32 %v103_v12, %v68_v16  ;;  %v80_v25 = vadd.f32 %v103_v12, %v69_v17 }
   0x9   :  { %v85_v34 = vadd.f32 %v81_v29, %v51_v28  ;;  %v86_v37 = vadd.f32 %v82_v33, %v52_v32 }
   0xa   :  { %v83_v30 = vadd.f32 %v79_v24, %v49_v20  ;;  %v84_v31 = vadd.f32 %v80_v25, %v50_v21 }
   0xb   :  { %v89_v38 = vmax.f32 %v85_v34, 0.0  ;;  %v90_v39 = vmax.f32 %v86_v37, 0.0 }
   0xc   :  { %v87_v35 = vmax.f32 %v83_v30, 0.0  ;;  %v88_v36 = vmax.f32 %v84_v31, 0.0 }
   0xd   :  { %94 = vst.msk [vmem:[%s199_s6 + $0x10] sm:$0xff] %vm91_vm0, %v89_v38  ;;  %95 = vst.msk [vmem:[%s199_s6 + $0x18] sm:$0xff] %vm91_vm0, %v90_v39 }
   0xe   :  { %92 = vst.msk [vmem:[%s199_s6] sm:$0xff] %vm91_vm0, %v87_v35  ;;  %93 = vst.msk [vmem:[%s199_s6 + $0x8] sm:$0xff] %vm91_vm0, %v88_v36 }

// kernel: basic_block_forward.4
= control target key start
LH: loop header
LB: loop body
LE: loop exit
PB: predicated region body
PF: predicated region fallthrough
CT: control target
= control target key end

     0   :  { %v64_v3 = vlaneseq  ;;  %vm746_vm1 = vmmov 1   ;;  %vm351_vm4 = vcmask 1046528   ;;  %vm109_vm5 = vsmask.f32 7424  ;;  %s921_s3 = inlined_call_operand.vmem [shape: bf16[3,128,128], index: 3, kind: input, shape index: {}]   ;;  %s922_s0 = inlined_call_operand.vmem [shape: bf16[2,18,128], index: 0, kind: input, shape index: {}]   ;;  %s923_s1 = inlined_call_operand.vmem [shape: f32[1,1,128], index: 1, kind: input, shape index: {}]   ;;  %s924_s2 = inlined_call_operand.vmem [shape: f32[1,1,128], index: 2, kind: input, shape index: {}]   ;;  %s925_s4 = inlined_call_operand.vmem [shape: bf16[2,16,128], index: 4, kind: output, shape index: {0}]   ;;  %s926_s5 = inlined_call_operand.vmem [shape: f32[1,2,128], index: 5, kind: output, shape index: {1}]  }
   0x1   :  { %v722_v0 = vld [vmem:[%s921_s3] sm:$0xff]   ;;  %v723_v1 = vld [vmem:[%s921_s3 + $0x8] sm:$0xff]   ;;  %v724_v2 = vld [vmem:[%s921_s3 + $0x10] sm:$0xff]   ;;  %vm525_vm6 = vcmask 1040384  }
   0x2   :  { %673 = vmatprep.subr.bf16.mxu0 %v722_v0  ;;  %v725_v4 = vld [vmem:[%s921_s3 + $0x18] sm:$0xff]   ;;  %v730_v5 = vld [vmem:[%s921_s3 + $0x40] sm:$0xff]   ;;  %v23_v7 = vld [vmem:[%s922_s0 + $0xc] sm:$0xff]   ;;  %v65_v9 = vshrl.u32 %v64_v3, 7 }
   0x3   :  { %674 = vmatpush3.bf16.msra.mxu0 %v722_v0  ;;  %v609_v6 = vld [vmem:[%s922_s0] sm:$0xff]   ;;  %v25_v8 = vld [vmem:[%s922_s0 + $0x14] sm:$0x1]  ;;  %653 = vmatprep.subr.bf16.mxu1 %v730_v5  ;;  %v29_v13 = vunpack.c.l.bf16 %v23_v7  ;;  %v30_v14 = vunpack.c.h.bf16 %v23_v7  ;;  %v732_v21 = vld [vmem:[%s921_s3 + $0x48] sm:$0xff]  }
   0x4   :  { %675 = vmatprep.subr.bf16.mxu0 %v723_v1  ;;  %v726_v10 = vld [vmem:[%s921_s3 + $0x20] sm:$0xff]   ;;  %v610_v11 = vunpack.c.l.bf16 %v609_v6  ;;  %v611_v12 = vunpack.c.h.bf16 %v609_v6  ;;  %654 = vmatpush3.bf16.msra.mxu1 %v730_v5  ;;  %v31_v16 = vunpack.c.l.bf16 %v25_v8  ;;  %vm68_vm0 = vcmp.ge.s32.totalorder %v65_v9, 1  ;;  %v734_v27 = vld [vmem:[%s921_s3 + $0x50] sm:$0xff]   ;;  %v727_v29 = vld [vmem:[%s921_s3 + $0x28] sm:$0xff]  }
   0x5   :  { %v807_v15 = vld [vmem:[%s923_s1] ss:$0 sm:$0xff]  ;;  %v824_v26 = vadd.s32 16, %v65_v9  ;;  %655 = vmatprep.subr.bf16.mxu1 %v732_v21  ;;  %vm834_vm2 = vmpackc.low %vm746_vm1, %vm68_vm0  ;;  %v736_v34 = vld [vmem:[%s921_s3 + $0x58] sm:$0xff]  }
   0x6   :  { %v812_v17 = vld [vmem:[%s924_s2] ss:$0 sm:$0xff]  ;;  %v39_v18 = vmul.f32 %v610_v11, %v807_v15  ;;  %v40_v19 = vmul.f32 %v611_v12, %v807_v15  ;;  %v42_v20 = vmul.f32 %v807_v15, %v29_v13  ;;  %v44_v22 = vmul.f32 %v807_v15, %v31_v16  ;;  %v728_v35 = vld [vmem:[%s921_s3 + $0x30] sm:$0xff]   ;;  %v729_v44 = vld [vmem:[%s921_s3 + $0x38] sm:$0xff]  }
   0x7   :  { %676 = vmatpush3.bf16.msra.mxu0 %v723_v1  ;;  %v43_v23 = vmul.f32 %v807_v15, %v30_v14  ;;  %vm73_vm3 = vcmp.le.s32.totalorder %v824_v26, 16  ;;  %v738_v39 = vld [vmem:[%s921_s3 + $0x60] sm:$0xff]   ;;  %v740_v46 = vld [vmem:[%s921_s3 + $0x68] sm:$0xff]   ;;  %v742_v53 = vld [vmem:[%s921_s3 + $0x70] sm:$0xff]  }
   0x8   :  { %677 = vmatprep.subr.bf16.mxu0 %v724_v2  ;;  %v52_v24 = vadd.f32 %v812_v17, %v39_v18  ;;  %v53_v25 = vadd.f32 %v812_v17, %v40_v19  ;;  %v55_v28 = vadd.f32 %v812_v17, %v42_v20  ;;  %656 = vmatpush3.bf16.msra.mxu1 %v732_v21  ;;  %v22_v49 = vld [vmem:[%s922_s0 + $0x8] sm:$0x1]  ;;  %v731_v52 = vld [vmem:[%s921_s3 + $0x80] sm:$0xff]   ;;  %v744_v60 = vld [vmem:[%s921_s3 + $0x78] sm:$0xff]  }
   0x9   :  { %657 = vmatprep.subr.bf16.mxu1 %v734_v27  ;;  %v57_v33 = vadd.f32 %v812_v17, %v44_v22  ;;  %v56_v36 = vadd.f32 %v812_v17, %v43_v23  ;;  %v28_v50 = vunpack.c.l.bf16 %v22_v49  ;;  %v733_v59 = vld [vmem:[%s921_s3 + $0x88] sm:$0xff]   ;;  %v735_v6 = vld [vmem:[%s921_s3 + $0x90] sm:$0xff]   ;;  %v737_v14 = vld [vmem:[%s921_s3 + $0x98] sm:$0xff]  }
   0xa   :  { %v58_v30 = vmax.f32 %v52_v24, 0.0  ;;  %v59_v31 = vmax.f32 %v53_v25, 0.0  ;;  %v61_v38 = vmax.f32 %v55_v28, 0.0  ;;  %v741_v18 = vld [vmem:[%s921_s3 + $0xa8] sm:$0xff]   ;;  %v743_v19 = vld [vmem:[%s921_s3 + $0xb0] sm:$0xff]   ;;  %v745_v20 = vld [vmem:[%s921_s3 + $0xb8] sm:$0xff]  }
   0xb   :  { %678 = vmatpush3.bf16.msra.mxu0 %v724_v2  ;;  %v63_v40 = vmax.f32 %v57_v33, 0.0  ;;  %v62_v42 = vmax.f32 %v56_v36, 0.0  ;;  %v41_v54 = vmul.f32 %v807_v15, %v28_v50 }
   0xc   :  { %679 = vmatprep.subr.bf16.mxu0 %v725_v4  ;;  %v571_v37 = vpack.c.bf16 %v59_v31, %v58_v30  ;;  %658 = vmatpush3.bf16.msra.mxu1 %v734_v27  ;;  %v86_v41 = vsel %vm68_vm0, %v61_v38, 0.0  ;;  %v83_v43 = vsel %vm68_vm0, %v58_v30, 0.0 }
   0xd   :  { %659 = vmatprep.subr.bf16.mxu1 %v736_v34  ;;  %v857_v45 = vpack.c.bf16 %v62_v42, %v86_v41  ;;  %v88_v47 = vsel %vm73_vm3, %v63_v40, 0.0  ;;  %v89_v48 = vpack.c.bf16 %v59_v31, %v83_v43  ;;  %v574_v57 = vpack.c.bf16 %v62_v42, %v61_v38 }
   0xe   :  { %689 = vmatprep.mubr.msk.bf16.mxu0 %vm834_vm2, %v571_v37  ;;  %v867_v51 = vpack.c.bf16 %v88_v47, %v88_v47  ;;  %v54_v58 = vadd.f32 %v812_v17, %v41_v54  ;;  %v739_v17 = vld [vmem:[%s921_s3 + $0xa0] sm:$0xff]  }
   0xf   :  { %680 = vmatpush3.bf16.msra.mxu0 %v725_v4  ;;  %v125_v55 = vshll.u32 %v857_v45, 16  ;;  %v113_v56 = vshll.u32 %v89_v48, 16  ;;  %v123_v62 = vshrl.u32 %v857_v45, 16  ;;  %v111_v1 = vshrl.u32 %v89_v48, 16 }
  0x10   :  { %681 = vmatprep.subr.bf16.mxu0 %v726_v10  ;;  %660 = vmatpush3.bf16.msra.mxu1 %v736_v34  ;;  %v60_v61 = vmax.f32 %v54_v58, 0.0  ;;  %v130_v0 = vshll.u32 %v867_v51, 16  ;;  %v352_v5 = vrot.slane %v89_v48, 1  ;;  %v355_v21 = vrot.slane %v857_v45, 1 }
  0x11   :  { %661 = vmatprep.subr.bf16.mxu1 %v738_v39  ;;  %v127_v63 = vrot.slane %v125_v55, 1  ;;  %v115_v2 = vrot.slane %v113_v56, 1  ;;  %v356_v22 = vrot.slane %v867_v51, 1 }
  0x12   :  { %v85_v3 = vsel %vm73_vm3, %v60_v61, 0.0  ;;  %v132_v8 = vrot.slane %v130_v0, 1 }
  0x13   :  { %682 = vmatpush3.bf16.msra.mxu0 %v726_v10  ;;  %v90_v4 = vpack.c.bf16 %v85_v3, %v85_v3  ;;  %v128_v7 = vor.u32 %v127_v63, %v123_v62  ;;  %v116_v9 = vor.u32 %v115_v2, %v111_v1  ;;  %v357_v23 = vsel %vm351_vm4, %v355_v21, %v356_v22 }
  0x14   :  { %683 = vmatprep.subr.bf16.mxu0 %v727_v29  ;;  %662 = vmatpush3.bf16.msra.mxu1 %v738_v39 }
  0x15   :  { %663 = vmatprep.subr.bf16.mxu1 %v740_v46  ;;  %v118_v10 = vshll.u32 %v90_v4, 16  ;;  %v353_v11 = vrot.slane %v90_v4, 1  ;;  %v133_v15 = vsel %vm109_vm5, %v128_v7, %v132_v8 }
  0x17   :  { %684 = vmatpush3.bf16.msra.mxu0 %v727_v29  ;;  %v120_v12 = vrot.slane %v118_v10, 1  ;;  %v354_v13 = vsel %vm351_vm4, %v352_v5, %v353_v11 }
  0x18   :  { %685 = vmatprep.subr.bf16.mxu0 %v728_v35  ;;  %664 = vmatpush3.bf16.msra.mxu1 %v740_v46 }
  0x19   :  { %665 = vmatprep.subr.bf16.mxu1 %v742_v53  ;;  %v121_v16 = vsel %vm109_vm5, %v116_v9, %v120_v12 }
  0x1a   :  { %669 = vmatprep.mubr.bf16.mxu1 %v121_v16 }
  0x1b   :  { %686 = vmatpush3.bf16.msra.mxu0 %v728_v35 }
  0x1c   :  { %687 = vmatprep.subr.bf16.mxu0 %v729_v44  ;;  %666 = vmatpush3.bf16.msra.mxu1 %v742_v53 }
  0x1d   :  { %667 = vmatprep.subr.bf16.mxu1 %v744_v60 }
  0x1f   :  { %688 = vmatpush3.bf16.msra.mxu0 %v729_v44 }
  0x20   :  { %693 = vmatprep.subr.bf16.mxu0 %v731_v52  ;;  %668 = vmatpush3.bf16.msra.mxu1 %v744_v60 }
  0x22   :  { %690 = vmatmul.mubr.msk.bf16.vlgmr.msra.gmra.mrb[0].mxu0 %vm834_vm2, %v574_v57 }
  0x23   :  { %694 = vmatpush3.bf16.msra.mxu0 %v731_v52  ;;  %709 = vmatprep.mubr.bf16.mxu0 %v354_v13 }
  0x24   :  { %695 = vmatprep.subr.bf16.mxu0 %v733_v59  ;;  %670 = vmatmul.mubr.bf16.vlgmr.msra.gmra.mrb[0].mxu1 %v133_v15 }
  0x27   :  { %696 = vmatpush3.bf16.msra.mxu0 %v733_v59 }
  0x28   :  { %697 = vmatprep.subr.bf16.mxu0 %v735_v6 }
  0x2b   :  { %698 = vmatpush3.bf16.msra.mxu0 %v735_v6 }
  0x2c   :  { %699 = vmatprep.subr.bf16.mxu0 %v737_v14 }
  0x2f   :  { %700 = vmatpush3.bf16.msra.mxu0 %v737_v14 }
  0x30   :  { %701 = vmatprep.subr.bf16.mxu0 %v739_v17 }
  0x33   :  { %702 = vmatpush3.bf16.msra.mxu0 %v739_v17 }
  0x34   :  { %703 = vmatprep.subr.bf16.mxu0 %v741_v18 }
  0x37   :  { %704 = vmatpush3.bf16.msra.mxu0 %v741_v18 }
  0x38   :  { %705 = vmatprep.subr.bf16.mxu0 %v743_v19 }
  0x3b   :  { %706 = vmatpush3.bf16.msra.mxu0 %v743_v19 }
  0x3c   :  { %707 = vmatprep.subr.bf16.mxu0 %v745_v20 }
  0x3f   :  { %708 = vmatpush3.bf16.msra.mxu0 %v745_v20 }
  0x42   :  { %710 = vmatmul.mubr.bf16.vlgmr.msra.gmra.mrb[0].mxu0 %v357_v23 }
  0xf7   :  { %v671_v24 = vpop.f32.mrb[0].mxu1 }
  0xf8   :  { %v235_v25 = vpop.f32.mrb[1].mxu1 }
  0xf9   :  { %v672_v26 = vpop.f32.mrb[2].mxu1 }
  0xfa   :  { %v238_v27 = vpop.f32.mrb[3].mxu1 }
 0x115   :  { %v711_v28 = vpop.f32.mrb[0].mxu0 }
 0x116   :  { %v713_v29 = vadd.f32 %v711_v28, %v671_v24  ;;  %v459_v30 = vpop.f32.mrb[1].mxu0 }
 0x117   :  { %v714_v31 = vadd.f32 %v459_v30, %v235_v25  ;;  %v712_v32 = vpop.f32.mrb[2].mxu0 }
 0x118   :  { %v715_v33 = vadd.f32 %v712_v32, %v672_v26  ;;  %v462_v34 = vpop.f32.mrb[3].mxu0 }
 0x119   :  { %v716_v35 = vadd.f32 %v462_v34, %v238_v27 }
 0x11a   :  { %v620_v36 = vpack.c.bf16 %v715_v33, %v713_v29 }
 0x11b   :  { %v615_v37 = vpack.c.bf16 %v716_v35, %v714_v31  ;;  %v498_v38 = vadd.f32 %v716_v35, %v714_v31 }
 0x11c   :  { %622 = vst [vmem:[%s925_s4 + $0x8] sm:$0xff] %v620_v36  }
 0x11d   :  { %616 = vst [vmem:[%s925_s4] sm:$0xff] %v615_v37   ;;  %v499_v39 = vadd.f32 %v713_v29, %v498_v38 }
 0x11f   :  { %v500_v40 = vadd.f32 %v715_v33, %v499_v39 }
 0x121   :  { %v501_v41 = vrot.slane %v500_v40, 4 }
 0x123   :  { %v502_v42 = vadd.f32 %v501_v41, %v500_v40 }
 0x125   :  { %v503_v43 = vrot.slane %v502_v42, 2 }
 0x127   :  { %v504_v44 = vadd.f32 %v503_v43, %v502_v42 }
 0x129   :  { %v505_v45 = vrot.slane %v504_v44, 1 }
 0x12b   :  { %v506_v46 = vadd.f32 %v505_v45, %v504_v44 }
 0x12d   :  { %v507_v47 = vmul.f32 0.03125, %v506_v46 }
 0x12f   :  { %v508_v48 = vsub.f32 %v714_v31, %v507_v47  ;;  %v509_v49 = vsub.f32 %v716_v35, %v507_v47  ;;  %v510_v50 = vsub.f32 %v713_v29, %v507_v47  ;;  %v511_v51 = vsub.f32 %v715_v33, %v507_v47 }
 0x131   :  { %v512_v52 = vmul.f32 %v508_v48, %v508_v48  ;;  %v513_v53 = vmul.f32 %v509_v49, %v509_v49  ;;  %v514_v54 = vmul.f32 %v510_v50, %v510_v50  ;;  %v515_v56 = vmul.f32 %v511_v51, %v511_v51 }
 0x133   :  { %v516_v55 = vadd.f32 %v513_v53, %v512_v52 }
 0x135   :  { %v517_v57 = vadd.f32 %v516_v55, %v514_v54 }
 0x137   :  { %v518_v58 = vadd.f32 %v517_v57, %v515_v56 }
 0x139   :  { %v519_v59 = vrot.slane %v518_v58, 4 }
 0x13b   :  { %v520_v60 = vadd.f32 %v519_v59, %v518_v58 }
 0x13d   :  { %v521_v61 = vrot.slane %v520_v60, 2 }
 0x13f   :  { %v522_v62 = vadd.f32 %v521_v61, %v520_v60 }
 0x141   :  { %v523_v63 = vrot.slane %v522_v62, 1 }
 0x143   :  { %v524_v0 = vadd.f32 %v523_v63, %v522_v62 }
 0x145   :  { %v526_v1 = vsel %vm525_vm6, %v506_v46, %v524_v0 }
 0x146   :  { %527 = vst [vmem:[%s926_s5] sm:$0x3] %v526_v1 }

// kernel: basic_block_forward.3
= control target key start
LH: loop header
LB: loop body
LE: loop exit
PB: predicated region body
PF: predicated region fallthrough
CT: control target
= control target key end

     0   :  { %vm40_vm0 = vsmask.f32 3328  ;;  %vm41_vm1 = vsmask.f32 7440  ;;  %vm328_vm3 = vcmask 1042432   ;;  %vm329_vm4 = vcmask 1046532   ;;  %s1457_s1 = inlined_call_operand.vmem [shape: bf16[3,128,128], index: 1, kind: input, shape index: {}]   ;;  %s1458_s0 = inlined_call_operand.vmem [shape: bf16[2,18,128], index: 0, kind: input, shape index: {}]   ;;  %s1459_s2 = inlined_call_operand.vmem [shape: bf16[128,128], index: 2, kind: input, shape index: {}]   ;;  %s1460_s3 = inlined_call_operand.vmem [shape: bf16[2,18,128], index: 3, kind: output, shape index: {0}]   ;;  %s1461_s4 = inlined_call_operand.vmem [shape: bf16[2,16,128], index: 4, kind: output, shape index: {1}]   ;;  %s1462_s5 = inlined_call_operand.vmem [shape: f32[1,4,128], index: 5, kind: output, shape index: {2}]  }
   0x1   :  { %v1055_v0 = vld [vmem:[%s1457_s1 + $0x40] sm:$0xff]   ;;  %v1057_v2 = vld [vmem:[%s1457_s1 + $0x48] sm:$0xff]   ;;  %v1059_v4 = vld [vmem:[%s1457_s1 + $0x50] sm:$0xff]   ;;  %vm498_vm6 = vcmask 1040384   ;;  %vm499_vm7 = vsmask.f32 256 }
   0x2   :  { %v1056_v1 = vld [vmem:[%s1457_s1] sm:$0xff]   ;;  %967 = vmatprep.subr.bf16.mxu1 %v1055_v0  ;;  %v1058_v3 = vld [vmem:[%s1457_s1 + $0x8] sm:$0xff]   ;;  %v1060_v5 = vld [vmem:[%s1457_s1 + $0x10] sm:$0xff]   ;;  %vm507_vm9 = vsmask.f32 7938  ;;  %vm569_vm11 = vcmask 1043456  }
   0x3   :  { %987 = vmatprep.subr.bf16.mxu0 %v1056_v1  ;;  %968 = vmatpush3.bf16.msra.mxu1 %v1055_v0  ;;  %v1061_v6 = vld [vmem:[%s1457_s1 + $0x58] sm:$0xff]   ;;  %v1063_v8 = vld [vmem:[%s1457_s1 + $0x60] sm:$0xff]   ;;  %v1065_v10 = vld [vmem:[%s1457_s1 + $0x68] sm:$0xff]   ;;  %vm527_vm12 = vsmask.f32 4368  ;;  %vm809_vm15 = vcmask 1041408  }
   0x4   :  { %988 = vmatpush3.bf16.msra.mxu0 %v1056_v1  ;;  %969 = vmatprep.subr.bf16.mxu1 %v1057_v2  ;;  %v1062_v7 = vld [vmem:[%s1457_s1 + $0x18] sm:$0xff]   ;;  %v1064_v9 = vld [vmem:[%s1457_s1 + $0x20] sm:$0xff]   ;;  %v1066_v11 = vld [vmem:[%s1457_s1 + $0x28] sm:$0xff]  }
   0x5   :  { %989 = vmatprep.subr.bf16.mxu0 %v1058_v3  ;;  %v18_v12 = vld [vmem:[%s1458_s0] sm:$0xf]  ;;  %v1161_v13 = vld [vmem:[%s1458_s0 + $0x4] sm:$0xf]  ;;  %v1166_v14 = vld [vmem:[%s1458_s0 + $0x8] sm:$0x1] }
   0x6   :  { %v44_v15 = vshrl.u32 %v18_v12, 16  ;;  %v47_v16 = vshll.u32 %v18_v12, 16  ;;  %v53_v17 = vshll.u32 %v1161_v13, 16  ;;  %v57_v18 = vshrl.u32 %v1161_v13, 16  ;;  %v1067_v19 = vld [vmem:[%s1457_s1 + $0x70] sm:$0xff]   ;;  %vm1193_vm2 = vmor %vm40_vm0, %vm41_vm1  ;;  %v1069_v43 = vld [vmem:[%s1457_s1 + $0x78] sm:$0xff]  }
   0x7   :  { %970 = vmatpush3.bf16.msra.mxu1 %v1057_v2  ;;  %v63_v20 = vshll.u32 %v1166_v14, 16  ;;  %v852_v21 = vcombine.low %v18_v12, %v1161_v13  ;;  %v1068_v26 = vld [vmem:[%s1457_s1 + $0x30] sm:$0xff]   ;;  %v20_v28 = vld [vmem:[%s1458_s0 + $0xc] sm:$0xf]  ;;  %v1070_v44 = vld [vmem:[%s1457_s1 + $0x38] sm:$0xff]   ;;  %v333_v59 = vrot.slane %v1161_v13, 5 }
   0x8   :  { %990 = vmatpush3.bf16.msra.mxu0 %v1058_v3  ;;  %971 = vmatprep.subr.bf16.mxu1 %v1059_v4  ;;  %v46_v22 = vrot.slane %v44_v15, 4  ;;  %v49_v23 = vrot.slane %v47_v16, 5  ;;  %v55_v24 = vrot.slane %v53_v17, 5  ;;  %v59_v25 = vrot.slane %v57_v18, 4  ;;  %v1184_v31 = vld [vmem:[%s1458_s0 + $0x10] sm:$0xf]  ;;  %vm1230_vm5 = vmor %vm328_vm3, %vm329_vm4 }
   0x9   :  { %991 = vmatprep.subr.bf16.mxu0 %v1060_v5  ;;  %v65_v27 = vrot.slane %v63_v20, 5  ;;  %1003 = vmatprep.mubr.bf16.mxu0 %v852_v21  ;;  %v1189_v32 = vld [vmem:[%s1458_s0 + $0x14] sm:$0x1]  ;;  %v68_v33 = vshrl.u32 %v20_v28, 16  ;;  %v71_v34 = vshll.u32 %v20_v28, 16  ;;  %v77_v36 = vshll.u32 %v1184_v31, 16  ;;  %vm1314_vm8 = vmand %vm498_vm6, %vm499_vm7 }
   0xa   :  { %v50_v29 = vor.u32 %v49_v23, %v46_v22  ;;  %v60_v30 = vor.u32 %v59_v25, %v55_v24  ;;  %v81_v37 = vshrl.u32 %v1184_v31, 16  ;;  %v87_v38 = vshll.u32 %v1189_v32, 16  ;;  %v1073_v54 = vld [vmem:[%s1459_s2] sm:$0xff]   ;;  %v1076_v62 = vld [vmem:[%s1459_s2 + $0x8] sm:$0xff]   ;;  %v1078_v3 = vld [vmem:[%s1459_s2 + $0x10] sm:$0xff]  }
   0xb   :  { %972 = vmatpush3.bf16.msra.mxu1 %v1059_v4  ;;  %v70_v41 = vrot.slane %v68_v33, 4  ;;  %v73_v42 = vrot.slane %v71_v34, 5  ;;  %v79_v45 = vrot.slane %v77_v36, 5  ;;  %v1072_v56 = vld [vmem:[%s1457_s1 + $0x80] sm:$0xff]   ;;  %v853_v61 = vcombine.low %v20_v28, %v1184_v31  ;;  %v1075_v63 = vld [vmem:[%s1457_s1 + $0x88] sm:$0xff]   ;;  %v1077_v4 = vld [vmem:[%s1457_s1 + $0x90] sm:$0xff]  }
   0xc   :  { %992 = vmatpush3.bf16.msra.mxu0 %v1060_v5  ;;  %973 = vmatprep.subr.bf16.mxu1 %v1061_v6  ;;  %v51_v39 = vrot.slane %v50_v29, 4  ;;  %v61_v40 = vrot.slane %v60_v30, 4  ;;  %v83_v46 = vrot.slane %v81_v37, 4  ;;  %v89_v52 = vrot.slane %v87_v38, 5  ;;  %v322_v5 = vld [vmem:[%s1458_s0] sm:$0xe]  ;;  %vm508_vm10 = vmand %vm498_vm6, %vm507_vm9 }
   0xd   :  { %993 = vmatprep.subr.bf16.mxu0 %v1062_v7  ;;  %v74_v49 = vor.u32 %v73_v42, %v70_v41  ;;  %v336_v0 = vrot.slane %v1166_v14, 5  ;;  %v335_v1 = vrot.slane %v333_v59, 4  ;;  %v1080_v16 = vld [vmem:[%s1459_s2 + $0x18] sm:$0xff]   ;;  %v589_v20 = vld [vmem:[%s1458_s0 + $0x10] sm:$0xf]  ;;  %v1082_v34 = vld [vmem:[%s1459_s2 + $0x20] sm:$0xff]  }
   0xe   :  { %v56_v47 = vsel %vm1193_vm2, %v51_v39, %v55_v24  ;;  %v66_v48 = vsel %vm1193_vm2, %v61_v40, %v65_v27  ;;  %v84_v51 = vor.u32 %v83_v46, %v79_v45  ;;  %v1079_v21 = vld [vmem:[%s1457_s1 + $0x98] sm:$0xff]   ;;  %v625_v33 = vshll.u32 %v589_v20, 16  ;;  %v1081_v37 = vld [vmem:[%s1457_s1 + $0xa0] sm:$0xff]   ;;  %v1084_v46 = vld [vmem:[%s1459_s2 + $0x28] sm:$0xff]  }
   0xf   :  { %974 = vmatpush3.bf16.msra.mxu1 %v1061_v6  ;;  %v842_v50 = vcombine.low %v56_v47, %v66_v48  ;;  %v75_v53 = vrot.slane %v74_v49, 4  ;;  %v585_v6 = vld [vmem:[%s1458_s0] sm:$0xf]  ;;  %v629_v36 = vshrl.u32 %v589_v20, 16  ;;  %v590_v48 = vld [vmem:[%s1458_s0 + $0x14] sm:$0x1]  ;;  %vm1390_vm13 = vmand %vm569_vm11, %vm507_vm9 }
  0x10   :  { %994 = vmatpush3.bf16.msra.mxu0 %v1062_v7  ;;  %975 = vmatprep.subr.bf16.mxu1 %v1063_v8  ;;  %v85_v55 = vrot.slane %v84_v51, 4  ;;  %v862_v7 = vrot.slane %v322_v5, 9  ;;  %v595_v12 = vshll.u32 %v585_v6, 16  ;;  %v1083_v49 = vld [vmem:[%s1457_s1 + $0xa8] sm:$0xff]   ;;  %vm1403_vm14 = vmor %vm499_vm7, %vm527_vm12 }
  0x11   :  { %995 = vmatprep.subr.bf16.mxu0 %v1064_v9  ;;  %983 = vmatprep.mubr.bf16.mxu1 %v842_v50  ;;  %v80_v57 = vsel %vm1193_vm2, %v75_v53, %v79_v45  ;;  %v631_v45 = vrot.slane %v629_v36, 4  ;;  %v1086_v53 = vld [vmem:[%s1459_s2 + $0x30] sm:$0xff]   ;;  %v504_v2 = vld [vmem:[%s1460_s3 + $0xc] sm:$0x1] }
  0x12   :  { %v90_v58 = vsel %vm1193_vm2, %v85_v55, %v89_v52  ;;  %v334_v17 = vsel %vm1230_vm5, %v862_v7, %v333_v59  ;;  %v597_v23 = vrot.slane %v595_v12, 5  ;;  %v635_v52 = vshll.u32 %v590_v48, 16  ;;  %v1085_v55 = vld [vmem:[%s1457_s1 + $0xb0] sm:$0xff]  }
  0x13   :  { %976 = vmatpush3.bf16.msra.mxu1 %v1063_v8  ;;  %v843_v60 = vcombine.low %v80_v57, %v90_v58  ;;  %v337_v8 = vsel %vm1230_vm5, %v335_v1, %v336_v0  ;;  %v505_v7 = vsel %vm1314_vm8, 0, %v504_v2 }
  0x14   :  { %996 = vmatpush3.bf16.msra.mxu0 %v1064_v9  ;;  %977 = vmatprep.subr.bf16.mxu1 %v1065_v10  ;;  %v586_v9 = vld [vmem:[%s1458_s0 + $0x4] sm:$0xf]  ;;  %v880_v22 = vcombine.low %v334_v17, %v337_v8  ;;  %v637_v59 = vrot.slane %v635_v52, 5  ;;  %v512_v8 = vld [vmem:[%s1460_s3 + $0x14] sm:$0x1] }
  0x15   :  { %997 = vmatprep.subr.bf16.mxu0 %v1066_v11  ;;  %v601_v13 = vshll.u32 %v586_v9, 16  ;;  %v605_v14 = vshrl.u32 %v586_v9, 16  ;;  %v501_v9 = vld [vmem:[%s1460_s3] sm:$0x1]  ;;  %506 = vst [vmem:[%s1460_s3 + $0xc] sm:$0x1] %v505_v7 }
  0x16   :  { %v502_v12 = vsel %vm1314_vm8, 0, %v501_v9 }
  0x17   :  { %978 = vmatpush3.bf16.msra.mxu1 %v1065_v10  ;;  %v587_v10 = vld [vmem:[%s1458_s0 + $0x8] sm:$0x1]  ;;  %v603_v24 = vrot.slane %v601_v13, 5  ;;  %v607_v25 = vrot.slane %v605_v14, 4  ;;  %503 = vst [vmem:[%s1460_s3] sm:$0x1] %v502_v12 }
  0x18   :  { %998 = vmatpush3.bf16.msra.mxu0 %v1066_v11  ;;  %979 = vmatprep.subr.bf16.mxu1 %v1067_v19  ;;  %v592_v11 = vshrl.u32 %v585_v6, 16  ;;  %v611_v15 = vshll.u32 %v587_v10, 16  ;;  %v509_v6 = vld [vmem:[%s1460_s3 + $0x8] sm:$0x1] }
  0x19   :  { %999 = vmatprep.subr.bf16.mxu0 %v1068_v26  ;;  %v608_v29 = vor.u32 %v607_v25, %v603_v24  ;;  %v510_v10 = vsel %vm508_vm10, 0, %v509_v6 }
  0x1a   :  { %v594_v18 = vrot.slane %v592_v11, 4  ;;  %v613_v30 = vrot.slane %v611_v15, 5  ;;  %v513_v11 = vsel %vm508_vm10, 0, %v512_v8  ;;  %511 = vst [vmem:[%s1460_s3 + $0x8] sm:$0x1] %v510_v10 }
  0x1b   :  { %980 = vmatpush3.bf16.msra.mxu1 %v1067_v19  ;;  %v588_v19 = vld [vmem:[%s1458_s0 + $0xc] sm:$0xf]  ;;  %v609_v39 = vrot.slane %v608_v29, 4  ;;  %514 = vst [vmem:[%s1460_s3 + $0x14] sm:$0x1] %v513_v11 }
  0x1c   :  { %1000 = vmatpush3.bf16.msra.mxu0 %v1068_v26  ;;  %981 = vmatprep.subr.bf16.mxu1 %v1069_v43  ;;  %v616_v26 = vshrl.u32 %v588_v19, 16  ;;  %v619_v27 = vshll.u32 %v588_v19, 16  ;;  %v598_v28 = vor.u32 %v597_v23, %v594_v18 }
  0x1d   :  { %1001 = vmatprep.subr.bf16.mxu0 %v1070_v44 }
  0x1e   :  { %v599_v38 = vrot.slane %v598_v28, 4  ;;  %v618_v40 = vrot.slane %v616_v26, 4  ;;  %v621_v41 = vrot.slane %v619_v27, 5 }
  0x1f   :  { %982 = vmatpush3.bf16.msra.mxu1 %v1069_v43  ;;  %v614_v43 = vsel %vm1193_vm2, %v609_v39, %v613_v30 }
  0x20   :  { %1002 = vmatpush3.bf16.msra.mxu0 %v1070_v44  ;;  %1027 = vmatprep.subr.bf16.mxu1 %v1073_v54  ;;  %v604_v42 = vsel %vm1193_vm2, %v599_v38, %v603_v24  ;;  %v627_v44 = vrot.slane %v625_v33, 5  ;;  %v622_v50 = vor.u32 %v621_v41, %v618_v40 }
  0x21   :  { %1007 = vmatprep.subr.bf16.mxu0 %v1072_v56  ;;  %v894_v47 = vcombine.low %v604_v42, %v614_v43 }
  0x22   :  { %984 = vmatmul.mubr.bf16.vlgmr.msra.gmra.mrb[0].mxu1 %v843_v60  ;;  %v632_v51 = vor.u32 %v631_v45, %v627_v44  ;;  %v623_v57 = vrot.slane %v622_v50, 4  ;;  %v343_v60 = vrot.slane %v1189_v32, 5  ;;  %v578_v50 = vld [vmem:[%s1460_s3 + $0xc] sm:$0xf] }
  0x23   :  { %1004 = vmatmul.mubr.bf16.vlgmr.msra.gmra.mrb[0].mxu0 %v853_v61  ;;  %1028 = vmatpush3.bf16.msra.mxu1 %v1073_v54  ;;  %v340_v54 = vrot.slane %v1184_v31, 5  ;;  %v1088_v31 = vld [vmem:[%s1459_s2 + $0x38] sm:$0xff]  }
  0x24   :  { %1008 = vmatpush3.bf16.msra.mxu0 %v1072_v56  ;;  %1029 = vmatprep.subr.bf16.mxu1 %v1076_v62  ;;  %v323_v56 = vld [vmem:[%s1458_s0 + $0xc] sm:$0xe]  ;;  %v633_v58 = vrot.slane %v632_v51, 4  ;;  %v628_v0 = vsel %vm1193_vm2, %v623_v57, %v627_v44  ;;  %v571_v57 = vld [vmem:[%s1460_s3] sm:$0xf] }
  0x25   :  { %1009 = vmatprep.subr.bf16.mxu0 %v1075_v63  ;;  %1023 = vmatprep.mubr.bf16.mxu0 %v880_v22  ;;  %v863_v61 = vrot.slane %v323_v56, 9 }
  0x26   :  { %1043 = vmatprep.mubr.bf16.mxu1 %v894_v47  ;;  %v638_v32 = vsel %vm1193_vm2, %v633_v58, %v637_v59 }
  0x27   :  { %1030 = vmatpush3.bf16.msra.mxu1 %v1076_v62  ;;  %v342_v62 = vrot.slane %v340_v54, 4  ;;  %v341_v1 = vsel %vm1230_vm5, %v863_v61, %v340_v54 }
  0x28   :  { %1010 = vmatpush3.bf16.msra.mxu0 %v1075_v63  ;;  %1031 = vmatprep.subr.bf16.mxu1 %v1078_v3  ;;  %v1087_v63 = vld [vmem:[%s1457_s1 + $0xb8] sm:$0xff]  }
  0x29   :  { %1011 = vmatprep.subr.bf16.mxu0 %v1077_v4 }
  0x2b   :  { %1032 = vmatpush3.bf16.msra.mxu1 %v1078_v3  ;;  %v344_v3 = vsel %vm1230_vm5, %v342_v62, %v343_v60  ;;  %v582_v62 = vld [vmem:[%s1460_s3 + $0x14] sm:$0x1] }
  0x2c   :  { %1012 = vmatpush3.bf16.msra.mxu0 %v1077_v4  ;;  %1033 = vmatprep.subr.bf16.mxu1 %v1080_v16  ;;  %v895_v4 = vcombine.low %v628_v0, %v638_v32  ;;  %v881_v5 = vcombine.low %v341_v1, %v344_v3 }
  0x2d   :  { %1013 = vmatprep.subr.bf16.mxu0 %v1079_v21 }
  0x2f   :  { %1034 = vmatpush3.bf16.msra.mxu1 %v1080_v16 }
  0x30   :  { %1014 = vmatpush3.bf16.msra.mxu0 %v1079_v21  ;;  %1035 = vmatprep.subr.bf16.mxu1 %v1082_v34 }
  0x31   :  { %1015 = vmatprep.subr.bf16.mxu0 %v1081_v37 }
  0x33   :  { %1036 = vmatpush3.bf16.msra.mxu1 %v1082_v34 }
  0x34   :  { %1016 = vmatpush3.bf16.msra.mxu0 %v1081_v37  ;;  %1037 = vmatprep.subr.bf16.mxu1 %v1084_v46 }
  0x35   :  { %1017 = vmatprep.subr.bf16.mxu0 %v1083_v49 }
  0x37   :  { %1038 = vmatpush3.bf16.msra.mxu1 %v1084_v46 }
  0x38   :  { %1018 = vmatpush3.bf16.msra.mxu0 %v1083_v49  ;;  %1039 = vmatprep.subr.bf16.mxu1 %v1086_v53 }
  0x39   :  { %1019 = vmatprep.subr.bf16.mxu0 %v1085_v55 }
  0x3b   :  { %1040 = vmatpush3.bf16.msra.mxu1 %v1086_v53 }
  0x3c   :  { %1020 = vmatpush3.bf16.msra.mxu0 %v1085_v55  ;;  %1041 = vmatprep.subr.bf16.mxu1 %v1088_v31 }
  0x3d   :  { %1021 = vmatprep.subr.bf16.mxu0 %v1087_v63 }
  0x3f   :  { %1042 = vmatpush3.bf16.msra.mxu1 %v1088_v31 }
  0x40   :  { %1022 = vmatpush3.bf16.msra.mxu0 %v1087_v63 }
  0x42   :  { %1044 = vmatmul.mubr.bf16.vlgmr.msra.gmra.mrb[4].mxu1 %v895_v4  ;;  %v575_v4 = vld [vmem:[%s1460_s3 + $0x8] sm:$0x1] }
  0x43   :  { %1024 = vmatmul.mubr.bf16.vlgmr.msra.gmra.mrb[0].mxu0 %v881_v5 }
  0xf5   :  { %v985_v13 = vpop.f32.mrb[0].mxu1 }
  0xf6   :  { %v198_v14 = vpop.f32.mrb[1].mxu1 }
  0xf7   :  { %v986_v15 = vpop.f32.mrb[2].mxu1 }
  0xf8   :  { %v201_v16 = vpop.f32.mrb[3].mxu1 }
 0x115   :  { %v1348_v17 = vpop.f32.mrb[4].mxu1 }
 0x116   :  { %v1025_v18 = vpop.f32.mrb[0].mxu0  ;;  %v1350_v19 = vpop.f32.mrb[5].mxu1 }
 0x117   :  { %v1352_v20 = vadd.f32 %v1025_v18, %v985_v13  ;;  %v452_v21 = vpop.f32.mrb[1].mxu0  ;;  %v1354_v22 = vpop.f32.mrb[6].mxu1 }
 0x118   :  { %v1356_v23 = vadd.f32 %v452_v21, %v198_v14  ;;  %v1026_v24 = vpop.f32.mrb[2].mxu0  ;;  %v924_v25 = vpack.c.bf16 %v1354_v22, %v1348_v17  ;;  %v1360_v26 = vpop.f32.mrb[7].mxu1 }
 0x119   :  { %v910_v27 = vpack.c.bf16 %v1352_v20, %v1352_v20  ;;  %v1364_v28 = vadd.f32 %v1026_v24, %v986_v15  ;;  %v455_v29 = vpop.f32.mrb[3].mxu0  ;;  %v919_v30 = vpack.c.bf16 %v1360_v26, %v1350_v19  ;;  %v780_v33 = vadd.f32 %v1360_v26, %v1350_v19 }
 0x11a   :  { %v908_v34 = vpack.c.bf16 %v1356_v23, %v1356_v23  ;;  %v1372_v36 = vadd.f32 %v455_v29, %v201_v16  ;;  %926 = vst [vmem:[%s1461_s4 + $0x8] sm:$0xff] %v924_v25  }
 0x11b   :  { %v547_v37 = vshrl.u32 %v910_v27, 16  ;;  %v550_v38 = vshll.u32 %v910_v27, 16  ;;  %v911_v39 = vpack.c.bf16 %v1364_v28, %v1364_v28  ;;  %920 = vst [vmem:[%s1461_s4] sm:$0xff] %v919_v30   ;;  %v781_v40 = vadd.f32 %v1348_v17, %v780_v33 }
 0x11c   :  { %v530_v41 = vshrl.u32 %v908_v34, 16  ;;  %v533_v42 = vshll.u32 %v908_v34, 16  ;;  %v471_v43 = vadd.f32 %v1372_v36, %v1356_v23  ;;  %v909_v44 = vpack.c.bf16 %v1372_v36, %v1372_v36 }
 0x11d   :  { %v549_v45 = vrot.slane %v547_v37, 7  ;;  %v555_v46 = vshrl.u32 %v911_v39, 16  ;;  %v558_v47 = vshll.u32 %v911_v39, 16  ;;  %v782_v48 = vadd.f32 %v1354_v22, %v781_v40 }
 0x11e   :  { %v532_v51 = vrot.slane %v530_v41, 7  ;;  %v472_v52 = vadd.f32 %v1352_v20, %v471_v43  ;;  %v538_v53 = vshrl.u32 %v909_v44, 16  ;;  %v541_v54 = vshll.u32 %v909_v44, 16 }
 0x11f   :  { %v552_v55 = vor.u32 %v550_v38, %v549_v45  ;;  %v553_v56 = vrot.slane %v549_v45, 4  ;;  %v557_v58 = vrot.slane %v555_v46, 7  ;;  %v783_v59 = vrot.slane %v782_v48, 4 }
 0x120   :  { %v535_v60 = vor.u32 %v533_v42, %v532_v51  ;;  %v536_v31 = vrot.slane %v532_v51, 4  ;;  %v473_v63 = vadd.f32 %v1364_v28, %v472_v52  ;;  %v540_v0 = vrot.slane %v538_v53, 7 }
 0x121   :  { %v579_v32 = vsel %vm1390_vm13, %v552_v55, %v578_v50  ;;  %v560_v1 = vor.u32 %v558_v47, %v557_v58  ;;  %v562_v3 = vrot.slane %v557_v58, 4  ;;  %v784_v5 = vadd.f32 %v783_v59, %v782_v48 }
 0x122   :  { %580 = vst [vmem:[%s1460_s3 + $0xc] sm:$0xf] %v579_v32  ;;  %v572_v2 = vsel %vm1390_vm13, %v535_v60, %v571_v57  ;;  %v474_v6 = vrot.slane %v473_v63, 4  ;;  %v543_v7 = vor.u32 %v541_v54, %v540_v0  ;;  %v545_v8 = vrot.slane %v540_v0, 4 }
 0x123   :  { %573 = vst [vmem:[%s1460_s3] sm:$0xf] %v572_v2  ;;  %v561_v9 = vsel %vm1403_vm14, %v553_v56, %v560_v1  ;;  %v583_v10 = vsel %vm1314_vm8, %v562_v3, %v582_v62  ;;  %v785_v11 = vrot.slane %v784_v5, 2 }
 0x124   :  { %581 = vst [vmem:[%s1460_s3 + $0x10] sm:$0xf] %v561_v9  ;;  %584 = vst [vmem:[%s1460_s3 + $0x14] sm:$0x1] %v583_v10  ;;  %v475_v12 = vadd.f32 %v474_v6, %v473_v63  ;;  %v544_v13 = vsel %vm1403_vm14, %v536_v31, %v543_v7  ;;  %v576_v14 = vsel %vm1314_vm8, %v545_v8, %v575_v4 }
 0x125   :  { %574 = vst [vmem:[%s1460_s3 + $0x4] sm:$0xf] %v544_v13  ;;  %577 = vst [vmem:[%s1460_s3 + $0x8] sm:$0x1] %v576_v14  ;;  %v786_v15 = vadd.f32 %v785_v11, %v784_v5 }
 0x126   :  { %v476_v16 = vrot.slane %v475_v12, 2 }
 0x127   :  { %v787_v18 = vrot.slane %v786_v15, 1 }
 0x128   :  { %v477_v21 = vadd.f32 %v476_v16, %v475_v12 }
 0x129   :  { %v788_v24 = vadd.f32 %v787_v18, %v786_v15 }
 0x12a   :  { %v478_v25 = vrot.slane %v477_v21, 1 }
 0x12b   :  { %v789_v27 = vmul.f32 0.03125, %v788_v24 }
 0x12c   :  { %v479_v29 = vadd.f32 %v478_v25, %v477_v21 }
 0x12d   :  { %v790_v30 = vsub.f32 %v1350_v19, %v789_v27  ;;  %v791_v35 = vsub.f32 %v1360_v26, %v789_v27  ;;  %v792_v33 = vsub.f32 %v1348_v17, %v789_v27  ;;  %v793_v34 = vsub.f32 %v1354_v22, %v789_v27 }
 0x12e   :  { %v480_v37 = vmul.f32 0.03125, %v479_v29 }
 0x12f   :  { %v794_v38 = vmul.f32 %v790_v30, %v790_v30  ;;  %v795_v39 = vmul.f32 %v791_v35, %v791_v35  ;;  %v796_v44 = vmul.f32 %v792_v33, %v792_v33  ;;  %v797_v26 = vmul.f32 %v793_v34, %v793_v34 }
 0x130   :  { %v481_v40 = vsub.f32 %v1356_v23, %v480_v37  ;;  %v482_v41 = vsub.f32 %v1372_v36, %v480_v37  ;;  %v483_v42 = vsub.f32 %v1352_v20, %v480_v37  ;;  %v484_v43 = vsub.f32 %v1364_v28, %v480_v37 }
 0x131   :  { %v798_v45 = vadd.f32 %v795_v39, %v794_v38 }
 0x132   :  { %v485_v19 = vmul.f32 %v481_v40, %v481_v40  ;;  %v486_v46 = vmul.f32 %v482_v41, %v482_v41  ;;  %v487_v17 = vmul.f32 %v483_v42, %v483_v42  ;;  %v488_v49 = vmul.f32 %v484_v43, %v484_v43 }
 0x133   :  { %v799_v47 = vadd.f32 %v798_v45, %v796_v44 }
 0x134   :  { %v489_v48 = vadd.f32 %v486_v46, %v485_v19 }
 0x135   :  { %v800_v22 = vadd.f32 %v799_v47, %v797_v26 }
 0x136   :  { %v490_v50 = vadd.f32 %v489_v48, %v487_v17 }
 0x137   :  { %v801_v51 = vrot.slane %v800_v22, 4 }
 0x138   :  { %v491_v52 = vadd.f32 %v490_v50, %v488_v49 }
 0x139   :  { %v802_v23 = vadd.f32 %v801_v51, %v800_v22 }
 0x13a   :  { %v492_v53 = vrot.slane %v491_v52, 4 }
 0x13b   :  { %v803_v36 = vrot.slane %v802_v23, 2 }
 0x13c   :  { %v493_v54 = vadd.f32 %v492_v53, %v491_v52 }
 0x13d   :  { %v804_v55 = vadd.f32 %v803_v36, %v802_v23 }
 0x13e   :  { %v494_v20 = vrot.slane %v493_v54, 2 }
 0x13f   :  { %v805_v57 = vrot.slane %v804_v55, 1 }
 0x140   :  { %v495_v28 = vadd.f32 %v494_v20, %v493_v54 }
 0x141   :  { %v806_v59 = vadd.f32 %v805_v57, %v804_v55 }
 0x142   :  { %v496_v56 = vrot.slane %v495_v28, 1 }
 0x144   :  { %v497_v58 = vadd.f32 %v496_v56, %v495_v28 }
 0x146   :  { %v808_v60 = vsel %vm498_vm6, %v479_v29, %v497_v58 }
 0x147   :  { %v810_v31 = vsel %vm809_vm15, %v808_v60, %v788_v24 }
 0x148   :  { %v812_v61 = vsel %vm328_vm3, %v810_v31, %v806_v59 }
 0x149   :  { %813 = vst [vmem:[%s1462_s5] sm:$0xf] %v812_v61 }

</bundles_post_ra>
